<compile_context>
chip_gen: v6e
topology: v6e:2x2x1
jax: 0.10.0
libtpu: 0.0.40
codegen_flags: <defaults>
</compile_context>

<pallas_src>
import math

import jax
import jax.numpy as jnp
import numpy as np
from jax.experimental import pallas as pl
from jax.experimental.pallas import tpu as pltpu

# ----------------------------------------------------------------------------
# Module hyper-parameters (settings.py values chosen here)
# ----------------------------------------------------------------------------
ALPHA_GRAPH = 0.5
MIN_ALPHA = 0.05
NUM_INJECTED_LAYERS = 2
TOTAL_LAYERS = 4
FIRST_LAYER_INJECTED = TOTAL_LAYERS - NUM_INJECTED_LAYERS
D_K = 64

# >= 2 grid steps per v7x TensorCore, and pipelining slack on single-TC chips.
_MIN_PLANE_STEPS = 4


def _round_up(x: int, m: int) -> int:
    return (x + m - 1) // m * m


def _vmem_budgets():
    """(per-block VMEM budget, scoped VMEM limit) derived from physical VMEM.

    v7x   (64 MiB physical)  -> 4 MiB blocks, 48 MiB scoped limit.
    v5e/v6e (128 MiB)        -> 8 MiB blocks, 96 MiB scoped limit
                                (well above v5e's 16 MiB default scoped limit).
    """
    cap = 64 * 1024 * 1024  # conservative (v7x) default
    try:
        cap = int(getattr(pltpu.get_tpu_info(), "vmem_capacity_bytes", cap)) or cap
    except Exception:  # non-TPU tracing / older runtime: keep v7x-safe default
        pass
    return cap // 16, (cap * 3) // 4


def _bilinear_matrix(out_size: int, in_size: int) -> jnp.ndarray:
    """1-D interpolation matrix reproducing torch bilinear, align_corners=False."""
    scale = in_size / out_size
    dst = np.arange(out_size, dtype=np.float64)
    src = scale * (dst + 0.5) - 0.5
    src = np.maximum(src, 0.0)                       # torch clamps negative src to 0
    i0 = np.minimum(np.floor(src).astype(np.int64), in_size - 1)
    i1 = np.minimum(i0 + 1, in_size - 1)
    lam = src - i0
    w = np.zeros((out_size, in_size), dtype=np.float64)
    w[np.arange(out_size), i0] += 1.0 - lam
    w[np.arange(out_size), i1] += lam
    return jnp.asarray(w, dtype=jnp.float32)


# ----------------------------------------------------------------------------
# Kernel 1: one-shot graph bias  (alpha * tanh(conv3x3(Wq @ (G @ Wk^T))))
# ----------------------------------------------------------------------------
def _graph_bias_kernel(scal_ref, wq_ref, g_ref, wkt_ref, bias_ref):
    nq, nk = bias_ref.shape

    # Bilinear resize as two MXU matmuls, reassociated so the intermediate is
    # lane-dense in nk (never in the tiny node dimension).
    tmp = jnp.dot(g_ref[...], wkt_ref[...], preferred_element_type=jnp.float32)
    g_res = jnp.dot(wq_ref[...], tmp, preferred_element_type=jnp.float32)

    # 3x3 conv, padding=1, single in/out channel (GraphBiasAdapterConv).
    # Rolls are shared per row-shift (8 rolls total); borders are masked with
    # 1-D iotas that broadcast in the compare (no (nq, nk) int32 planes).
    rows = jax.lax.broadcasted_iota(jnp.int32, (nq, 1), 0)
    cols = jax.lax.broadcasted_iota(jnp.int32, (1, nk), 1)
    acc = jnp.zeros((nq, nk), jnp.float32)
    for du in (-1, 0, 1):
        rolled_u = g_res if du == 0 else pltpu.roll(g_res, (-du) % nq, axis=0)
        row_ok = (rows + du >= 0) & (rows + du < nq)            # (nq, 1)
        for dv in (-1, 0, 1):
            tap = rolled_u if dv == 0 else pltpu.roll(rolled_u, (-dv) % nk, axis=1)
            ok = row_ok & (cols + dv >= 0) & (cols + dv < nk)   # broadcast -> (nq, nk)
            tap = jnp.where(ok, tap, jnp.float32(0.0))
            acc = acc + scal_ref[(du + 1) * 3 + (dv + 1)] * tap
    acc = acc + scal_ref[9]                          # conv bias
    bias_ref[...] = scal_ref[10] * jnp.tanh(acc)     # alpha folded in here


# ----------------------------------------------------------------------------
# Kernel 2: hot path -- biased row softmax over (B*H, Nq, Nk), unpadded
# ----------------------------------------------------------------------------
def _bias_softmax_kernel(bias_ref, attn_ref, out_ref):
    # Block last dim equals the full Nk, so the axis -1 reductions see exactly
    # the valid keys: no lane masking / padding needed anywhere.
    s = attn_ref[...].astype(jnp.float32) + bias_ref[...][None, :, :]
    m = jnp.max(s, axis=-1, keepdims=True)
    p = jnp.exp(s - m)
    # Exact EUP reciprocal: the kernel is HBM-bound, so this is off the
    # critical path and rows sum to 1 at f32 precision (approx would be ~1e-3).
    inv = pl.reciprocal(jnp.sum(p, axis=-1, keepdims=True))
    out_ref[...] = (p * inv).astype(out_ref.dtype)


def _choose_tiles(n_planes: int, nq: int, nk: int, block_budget: int):
    """Pick (planes per block, query rows per block) under the VMEM budget."""
    # Account for the internal (8, 128) VMEM tile padding when sizing blocks.
    plane_bytes = _round_up(nq, 8) * _round_up(nk, 128) * 4
    if plane_bytes <= block_budget:
        t_planes = max(1, min(n_planes, block_budget // plane_bytes))
        # Keep >= _MIN_PLANE_STEPS plane-axis grid steps when the workload has
        # enough planes: v7x megacore splits the plane axis across both
        # TensorCores and every chip gets DMA/compute overlap (pipelining).
        if n_planes >= _MIN_PLANE_STEPS:
            t_planes = max(1, min(t_planes, n_planes // _MIN_PLANE_STEPS))
        return t_planes, nq
    # A single plane exceeds the budget: tile the query (sublane) axis instead;
    # partial trailing blocks are handled by Pallas boundary clipping.
    tq = max(8, (block_budget // (_round_up(nk, 128) * 4)) // 8 * 8)
    return 1, min(tq, nq)


# ----------------------------------------------------------------------------
# Wrapper (plain-JAX glue: shapes, params, interpolation matrices)
# ----------------------------------------------------------------------------
def graph_attention_bias_forward(attn_scores, graph_adj_matrix, layer_idx, params):
    """Pallas implementation of GraphAttentionBias.forward."""
    if layer_idx < FIRST_LAYER_INJECTED:
        return attn_scores                           # early-exit path (no kernel)

    if attn_scores.ndim == 3:                        # (B, Nq, Nk) -> (B, 1, Nq, Nk)
        attn_scores = attn_scores[:, None, :, :]
    ba, he, nq, nk = attn_scores.shape

    g = graph_adj_matrix
    if g.ndim == 3:                                  # (1, N, N): same graph for all batches
        g = g[0]
    # TODO(synk): distinct per-batch graphs (leading dim > 1) would need a batched
    # bias; the reference module broadcasts a single graph, which is handled here.
    n_rows, n_cols = g.shape

    idx = layer_idx - FIRST_LAYER_INJECTED
    conv_w = params["conv_w"][idx]                   # (3, 3)  GraphBiasAdapterConv weight
    conv_b = params["conv_b"][idx]                   # ()      GraphBiasAdapterConv bias
    logit = params["alpha_logits"][idx]              # ()      learnable alpha logit
    alpha = MIN_ALPHA + (1.0 - MIN_ALPHA) * jax.nn.sigmoid(logit)

    block_budget, vmem_limit = _vmem_budgets()       # generation-aware sizing

    # --- 1) one-shot graph bias (tiny single-step pallas_call) ----------------
    wq = _bilinear_matrix(nq, n_rows)                # (nq, N)
    wkt = _bilinear_matrix(nk, n_cols).T             # (N, nk)
    scal = jnp.concatenate(
        [conv_w.reshape(-1), conv_b.reshape(1), alpha.reshape(1)]
    ).astype(jnp.float32)                            # (11,): 3x3 w, bias, alpha

    # TODO(synk): row-tile this kernel (with halo rows for the 3x3 conv) if
    # nq*nk*4 ever approaches the VMEM limit (e.g. nq=nk=4096 on v7x); it is
    # negligible at typical shapes and runs once per layer.
    bias = pl.pallas_call(
        _graph_bias_kernel,
        out_shape=jax.ShapeDtypeStruct((nq, nk), jnp.float32),
        grid_spec=pltpu.PrefetchScalarGridSpec(
            num_scalar_prefetch=0,
            grid=(1,),
            in_specs=[
                pl.BlockSpec(memory_space=pltpu.MemorySpace.SMEM),        # conv w+b, alpha
                pl.BlockSpec((nq, n_rows), lambda i: (0, 0)),             # Wq
                pl.BlockSpec((n_rows, n_cols), lambda i: (0, 0)),         # G
                pl.BlockSpec((n_cols, nk), lambda i: (0, 0)),             # Wk^T
            ],
            out_specs=pl.BlockSpec((nq, nk), lambda i: (0, 0)),
        ),
        compiler_params=pltpu.CompilerParams(
            dimension_semantics=("arbitrary",),
            vmem_limit_bytes=vmem_limit),
    )(scal, wq, g.astype(jnp.float32), wkt)

    # --- 2) hot path: biased row softmax over unpadded (B*H, Nq, Nk) ----------
    n_planes = ba * he
    attn_flat = attn_scores.reshape(n_planes, nq, nk)   # free reshape (no copy)

    t_planes, tq = _choose_tiles(n_planes, nq, nk, block_budget)
    grid = (pl.cdiv(nq, tq), pl.cdiv(n_planes, t_planes))  # planes innermost

    # No input_output_aliases: without buffer donation XLA would add a
    # defensive copy (an extra HBM pass).  Callers under jit that donate the
    # attention buffer can alias it to the output for a true in-place update.
    out = pl.pallas_call(
        _bias_softmax_kernel,
        out_shape=jax.ShapeDtypeStruct((n_planes, nq, nk), attn_scores.dtype),
        grid_spec=pltpu.PrefetchScalarGridSpec(
            num_scalar_prefetch=0,
            grid=grid,
            in_specs=[
                # Bias block index is constant over the inner (plane) loop:
                # DMA'd once per query block, not once per plane.
                pl.BlockSpec((tq, nk), lambda q, p: (q, 0)),
                pl.BlockSpec((t_planes, tq, nk), lambda q, p: (p, q, 0)),
            ],
            out_specs=pl.BlockSpec((t_planes, tq, nk), lambda q, p: (p, q, 0)),
        ),
        compiler_params=pltpu.CompilerParams(
            dimension_semantics=("parallel", "parallel"),  # no cross-step state
            vmem_limit_bytes=vmem_limit),
    )(bias, attn_flat)

    return out.reshape(ba, he, nq, nk)


# ----------------------------------------------------------------------------
# Deterministic parameter init + pure-JAX reference + run
# ----------------------------------------------------------------------------
def init_params():
    eps = 1e-6
    ratio = max((ALPHA_GRAPH - MIN_ALPHA) / (1.0 - MIN_ALPHA + eps), eps)
    w_init = math.log(ratio / (1.0 - ratio + eps))
    key = jax.random.PRNGKey(0)
    kw, kb = jax.random.split(key)
    return {
        "alpha_logits": jnp.full((NUM_INJECTED_LAYERS,), w_init, jnp.float32),
        # GraphBiasAdapterConv: Conv2d(1 -> 1, k=3, pad=1), channel squeezed.
        "conv_w": 0.1 * jax.random.normal(kw, (NUM_INJECTED_LAYERS, 3, 3), jnp.float32),
        "conv_b": 0.1 * jax.random.normal(kb, (NUM_INJECTED_LAYERS,), jnp.float32),
    }


def _reference(attn, g, layer_idx, params):
    """Pure-JAX reference of the same forward for verification."""
    ba, he, nq, nk = attn.shape
    idx = layer_idx - FIRST_LAYER_INJECTED
    alpha = MIN_ALPHA + (1.0 - MIN_ALPHA) * jax.nn.sigmoid(params["alpha_logits"][idx])
    wq = _bilinear_matrix(nq, g.shape[0])
    wk = _bilinear_matrix(nk, g.shape[1])
    g_res = wq @ g.astype(jnp.float32) @ wk.T
    pad = jnp.pad(g_res, ((1, 1), (1, 1)))
    conv = params["conv_b"][idx]
    for u in range(3):
        for v in range(3):
            conv = conv + params["conv_w"][idx, u, v] * pad[u:u + nq, v:v + nk]
    g_ad = jnp.tanh(conv)
    return jax.nn.softmax(attn + alpha * g_ad[None, None], axis=-1)


if __name__ == "__main__":
    ba, he, nq, nk, n_nodes = 2, 4, 128, 128, 16
    layer_idx = 2                                    # >= FIRST_LAYER_INJECTED -> inject

    key = jax.random.PRNGKey(0)
    k_attn, k_adj = jax.random.split(key)
    attn_scores = jax.random.normal(k_attn, (ba, he, nq, nk), jnp.float32)
    graph_adj = (jax.random.uniform(k_adj, (n_nodes, n_nodes)) > 0.5).astype(jnp.float32)

    params = init_params()

    # Early-exit (non-injected) layer behaves as identity.
    out_skip = graph_attention_bias_forward(attn_scores, graph_adj, 0, params)
    assert out_skip is attn_scores

    out = graph_attention_bias_forward(attn_scores, graph_adj, layer_idx, params)
    out = jax.block_until_ready(out)

    ref = _reference(attn_scores, graph_adj, layer_idx, params)
    np.testing.assert_allclose(np.asarray(out), np.asarray(ref), rtol=1e-4, atol=1e-5)
    row_sums = np.asarray(jnp.sum(out, axis=-1))
    np.testing.assert_allclose(row_sums, np.ones_like(row_sums), rtol=1e-4, atol=1e-4)

    print("KERNEL_OK")
</pallas_src>

<mosaic_0001>
module attributes {stable_mosaic.version = 11 : i64} {
  func.func @_graph_bias_kernel(%arg0: i32, %arg1: memref<11xf32, #tpu.memory_space<smem>>, %arg2: memref<128x16xf32, #tpu.memory_space<vmem>>, %arg3: memref<16x16xf32, #tpu.memory_space<vmem>>, %arg4: memref<16x128xf32, #tpu.memory_space<vmem>>, %arg5: memref<128x128xf32, #tpu.memory_space<vmem>>) attributes {dimension_semantics = [#tpu.dimension_semantics<arbitrary>], iteration_bounds = array<i64: 1>, scalar_prefetch = 0 : i64, scratch_operands = 0 : i64, tpu.core_type = #tpu.core_type<tc>, window_params = [{transform_indices = @transform_0, window_bounds = array<i64: 11>}, {pipeline_mode = #tpu.pipeline_mode<synchronous>, transform_indices = @transform_1, window_bounds = array<i64: 128, 16>}, {pipeline_mode = #tpu.pipeline_mode<synchronous>, transform_indices = @transform_2, window_bounds = array<i64: 16, 16>}, {pipeline_mode = #tpu.pipeline_mode<synchronous>, transform_indices = @transform_3, window_bounds = array<i64: 16, 128>}, {pipeline_mode = #tpu.pipeline_mode<synchronous>, transform_indices = @transform_4, window_bounds = array<i64: 128, 128>}]} {
    %c0 = arith.constant 0 : index
    %c0_0 = arith.constant 0 : index
    %0 = vector.load %arg3[%c0, %c0_0] : memref<16x16xf32, #tpu.memory_space<vmem>>, vector<16x16xf32>
    %c0_1 = arith.constant 0 : index
    %c0_2 = arith.constant 0 : index
    %1 = vector.load %arg4[%c0_1, %c0_2] : memref<16x128xf32, #tpu.memory_space<vmem>>, vector<16x128xf32>
    %cst = arith.constant dense<0.000000e+00> : vector<16x128xf32>
    %2 = tpu.matmul %0, %1, %cst {dimension_numbers = #tpu.dot_dimension_numbers<[1], [0], [0], [1], [0, 0, 1, 1], [], []>} : vector<16x16xf32>, vector<16x128xf32>, vector<16x128xf32> -> vector<16x128xf32>
    %c0_3 = arith.constant 0 : index
    %c0_4 = arith.constant 0 : index
    %3 = vector.load %arg2[%c0_3, %c0_4] : memref<128x16xf32, #tpu.memory_space<vmem>>, vector<128x16xf32>
    %cst_5 = arith.constant dense<0.000000e+00> : vector<128x128xf32>
    %4 = tpu.matmul %3, %2, %cst_5 {dimension_numbers = #tpu.dot_dimension_numbers<[1], [0], [0], [1], [0, 0, 1, 1], [], []>} : vector<128x16xf32>, vector<16x128xf32>, vector<128x128xf32> -> vector<128x128xf32>
    %5 = tpu.iota {dimensions = array<i32: 0>} : vector<128x1xi32>
    %6 = tpu.iota {dimensions = array<i32: 1>} : vector<1x128xi32>
    %cst_6 = arith.constant 0.000000e+00 : f32
    %7 = vector.broadcast %cst_6 : f32 to vector<128x128xf32>
    %c1_i32 = arith.constant 1 : i32
    %8 = tpu.dynamic_rotate %4 by %c1_i32 dim 0 : vector<128x128xf32>, i32 -> vector<128x128xf32>
    %c-1_i32 = arith.constant -1 : i32
    %9 = vector.broadcast %c-1_i32 : i32 to vector<128x1xi32>
    %10 = arith.addi %5, %9 : vector<128x1xi32>
    %c0_i32 = arith.constant 0 : i32
    %11 = vector.broadcast %c0_i32 : i32 to vector<128x1xi32>
    %12 = arith.cmpi sge, %10, %11 : vector<128x1xi32>
    %c-1_i32_7 = arith.constant -1 : i32
    %13 = vector.broadcast %c-1_i32_7 : i32 to vector<128x1xi32>
    %14 = arith.addi %5, %13 : vector<128x1xi32>
    %c128_i32 = arith.constant 128 : i32
    %15 = vector.broadcast %c128_i32 : i32 to vector<128x1xi32>
    %16 = arith.cmpi slt, %14, %15 : vector<128x1xi32>
    %17 = arith.andi %12, %16 : vector<128x1xi1>
    %c1_i32_8 = arith.constant 1 : i32
    %18 = tpu.dynamic_rotate %8 by %c1_i32_8 dim 1 : vector<128x128xf32>, i32 -> vector<128x128xf32>
    %c-1_i32_9 = arith.constant -1 : i32
    %19 = vector.broadcast %c-1_i32_9 : i32 to vector<1x128xi32>
    %20 = arith.addi %6, %19 : vector<1x128xi32>
    %c0_i32_10 = arith.constant 0 : i32
    %21 = vector.broadcast %c0_i32_10 : i32 to vector<1x128xi32>
    %22 = arith.cmpi sge, %20, %21 : vector<1x128xi32>
    %23 = vector.broadcast %17 : vector<128x1xi1> to vector<128x128xi1>
    %24 = vector.broadcast %22 : vector<1x128xi1> to vector<128x128xi1>
    %25 = arith.andi %23, %24 : vector<128x128xi1>
    %c-1_i32_11 = arith.constant -1 : i32
    %26 = vector.broadcast %c-1_i32_11 : i32 to vector<1x128xi32>
    %27 = arith.addi %6, %26 : vector<1x128xi32>
    %c128_i32_12 = arith.constant 128 : i32
    %28 = vector.broadcast %c128_i32_12 : i32 to vector<1x128xi32>
    %29 = arith.cmpi slt, %27, %28 : vector<1x128xi32>
    %30 = vector.broadcast %29 : vector<1x128xi1> to vector<128x128xi1>
    %31 = arith.andi %25, %30 : vector<128x128xi1>
    %cst_13 = arith.constant 0.000000e+00 : f32
    %32 = vector.broadcast %cst_13 : f32 to vector<128x128xf32>
    %33 = arith.select %31, %18, %32 : vector<128x128xi1>, vector<128x128xf32>
    %c0_14 = arith.constant 0 : index
    %34 = memref.load %arg1[%c0_14] : memref<11xf32, #tpu.memory_space<smem>>
    %35 = vector.broadcast %34 : f32 to vector<128x128xf32>
    %36 = arith.mulf %35, %33 : vector<128x128xf32>
    %37 = arith.addf %7, %36 : vector<128x128xf32>
    %c0_i32_15 = arith.constant 0 : i32
    %38 = vector.broadcast %c0_i32_15 : i32 to vector<1x128xi32>
    %39 = arith.addi %6, %38 : vector<1x128xi32>
    %c0_i32_16 = arith.constant 0 : i32
    %40 = vector.broadcast %c0_i32_16 : i32 to vector<1x128xi32>
    %41 = arith.cmpi sge, %39, %40 : vector<1x128xi32>
    %42 = vector.broadcast %17 : vector<128x1xi1> to vector<128x128xi1>
    %43 = vector.broadcast %41 : vector<1x128xi1> to vector<128x128xi1>
    %44 = arith.andi %42, %43 : vector<128x128xi1>
    %c0_i32_17 = arith.constant 0 : i32
    %45 = vector.broadcast %c0_i32_17 : i32 to vector<1x128xi32>
    %46 = arith.addi %6, %45 : vector<1x128xi32>
    %c128_i32_18 = arith.constant 128 : i32
    %47 = vector.broadcast %c128_i32_18 : i32 to vector<1x128xi32>
    %48 = arith.cmpi slt, %46, %47 : vector<1x128xi32>
    %49 = vector.broadcast %48 : vector<1x128xi1> to vector<128x128xi1>
    %50 = arith.andi %44, %49 : vector<128x128xi1>
    %cst_19 = arith.constant 0.000000e+00 : f32
    %51 = vector.broadcast %cst_19 : f32 to vector<128x128xf32>
    %52 = arith.select %50, %8, %51 : vector<128x128xi1>, vector<128x128xf32>
    %c1 = arith.constant 1 : index
    %53 = memref.load %arg1[%c1] : memref<11xf32, #tpu.memory_space<smem>>
    %54 = vector.broadcast %53 : f32 to vector<128x128xf32>
    %55 = arith.mulf %54, %52 : vector<128x128xf32>
    %56 = arith.addf %37, %55 : vector<128x128xf32>
    %c127_i32 = arith.constant 127 : i32
    %57 = tpu.dynamic_rotate %8 by %c127_i32 dim 1 : vector<128x128xf32>, i32 -> vector<128x128xf32>
    %c1_i32_20 = arith.constant 1 : i32
    %58 = vector.broadcast %c1_i32_20 : i32 to vector<1x128xi32>
    %59 = arith.addi %6, %58 : vector<1x128xi32>
    %c0_i32_21 = arith.constant 0 : i32
    %60 = vector.broadcast %c0_i32_21 : i32 to vector<1x128xi32>
    %61 = arith.cmpi sge, %59, %60 : vector<1x128xi32>
    %62 = vector.broadcast %17 : vector<128x1xi1> to vector<128x128xi1>
    %63 = vector.broadcast %61 : vector<1x128xi1> to vector<128x128xi1>
    %64 = arith.andi %62, %63 : vector<128x128xi1>
    %c1_i32_22 = arith.constant 1 : i32
    %65 = vector.broadcast %c1_i32_22 : i32 to vector<1x128xi32>
    %66 = arith.addi %6, %65 : vector<1x128xi32>
    %c128_i32_23 = arith.constant 128 : i32
    %67 = vector.broadcast %c128_i32_23 : i32 to vector<1x128xi32>
    %68 = arith.cmpi slt, %66, %67 : vector<1x128xi32>
    %69 = vector.broadcast %68 : vector<1x128xi1> to vector<128x128xi1>
    %70 = arith.andi %64, %69 : vector<128x128xi1>
    %cst_24 = arith.constant 0.000000e+00 : f32
    %71 = vector.broadcast %cst_24 : f32 to vector<128x128xf32>
    %72 = arith.select %70, %57, %71 : vector<128x128xi1>, vector<128x128xf32>
    %c2 = arith.constant 2 : index
    %73 = memref.load %arg1[%c2] : memref<11xf32, #tpu.memory_space<smem>>
    %74 = vector.broadcast %73 : f32 to vector<128x128xf32>
    %75 = arith.mulf %74, %72 : vector<128x128xf32>
    %76 = arith.addf %56, %75 : vector<128x128xf32>
    %c0_i32_25 = arith.constant 0 : i32
    %77 = vector.broadcast %c0_i32_25 : i32 to vector<128x1xi32>
    %78 = arith.addi %5, %77 : vector<128x1xi32>
    %c0_i32_26 = arith.constant 0 : i32
    %79 = vector.broadcast %c0_i32_26 : i32 to vector<128x1xi32>
    %80 = arith.cmpi sge, %78, %79 : vector<128x1xi32>
    %c0_i32_27 = arith.constant 0 : i32
    %81 = vector.broadcast %c0_i32_27 : i32 to vector<128x1xi32>
    %82 = arith.addi %5, %81 : vector<128x1xi32>
    %c128_i32_28 = arith.constant 128 : i32
    %83 = vector.broadcast %c128_i32_28 : i32 to vector<128x1xi32>
    %84 = arith.cmpi slt, %82, %83 : vector<128x1xi32>
    %85 = arith.andi %80, %84 : vector<128x1xi1>
    %c1_i32_29 = arith.constant 1 : i32
    %86 = tpu.dynamic_rotate %4 by %c1_i32_29 dim 1 : vector<128x128xf32>, i32 -> vector<128x128xf32>
    %c-1_i32_30 = arith.constant -1 : i32
    %87 = vector.broadcast %c-1_i32_30 : i32 to vector<1x128xi32>
    %88 = arith.addi %6, %87 : vector<1x128xi32>
    %c0_i32_31 = arith.constant 0 : i32
    %89 = vector.broadcast %c0_i32_31 : i32 to vector<1x128xi32>
    %90 = arith.cmpi sge, %88, %89 : vector<1x128xi32>
    %91 = vector.broadcast %85 : vector<128x1xi1> to vector<128x128xi1>
    %92 = vector.broadcast %90 : vector<1x128xi1> to vector<128x128xi1>
    %93 = arith.andi %91, %92 : vector<128x128xi1>
    %c-1_i32_32 = arith.constant -1 : i32
    %94 = vector.broadcast %c-1_i32_32 : i32 to vector<1x128xi32>
    %95 = arith.addi %6, %94 : vector<1x128xi32>
    %c128_i32_33 = arith.constant 128 : i32
    %96 = vector.broadcast %c128_i32_33 : i32 to vector<1x128xi32>
    %97 = arith.cmpi slt, %95, %96 : vector<1x128xi32>
    %98 = vector.broadcast %97 : vector<1x128xi1> to vector<128x128xi1>
    %99 = arith.andi %93, %98 : vector<128x128xi1>
    %cst_34 = arith.constant 0.000000e+00 : f32
    %100 = vector.broadcast %cst_34 : f32 to vector<128x128xf32>
    %101 = arith.select %99, %86, %100 : vector<128x128xi1>, vector<128x128xf32>
    %c3 = arith.constant 3 : index
    %102 = memref.load %arg1[%c3] : memref<11xf32, #tpu.memory_space<smem>>
    %103 = vector.broadcast %102 : f32 to vector<128x128xf32>
    %104 = arith.mulf %103, %101 : vector<128x128xf32>
    %105 = arith.addf %76, %104 : vector<128x128xf32>
    %c0_i32_35 = arith.constant 0 : i32
    %106 = vector.broadcast %c0_i32_35 : i32 to vector<1x128xi32>
    %107 = arith.addi %6, %106 : vector<1x128xi32>
    %c0_i32_36 = arith.constant 0 : i32
    %108 = vector.broadcast %c0_i32_36 : i32 to vector<1x128xi32>
    %109 = arith.cmpi sge, %107, %108 : vector<1x128xi32>
    %110 = vector.broadcast %85 : vector<128x1xi1> to vector<128x128xi1>
    %111 = vector.broadcast %109 : vector<1x128xi1> to vector<128x128xi1>
    %112 = arith.andi %110, %111 : vector<128x128xi1>
    %c0_i32_37 = arith.constant 0 : i32
    %113 = vector.broadcast %c0_i32_37 : i32 to vector<1x128xi32>
    %114 = arith.addi %6, %113 : vector<1x128xi32>
    %c128_i32_38 = arith.constant 128 : i32
    %115 = vector.broadcast %c128_i32_38 : i32 to vector<1x128xi32>
    %116 = arith.cmpi slt, %114, %115 : vector<1x128xi32>
    %117 = vector.broadcast %116 : vector<1x128xi1> to vector<128x128xi1>
    %118 = arith.andi %112, %117 : vector<128x128xi1>
    %cst_39 = arith.constant 0.000000e+00 : f32
    %119 = vector.broadcast %cst_39 : f32 to vector<128x128xf32>
    %120 = arith.select %118, %4, %119 : vector<128x128xi1>, vector<128x128xf32>
    %c4 = arith.constant 4 : index
    %121 = memref.load %arg1[%c4] : memref<11xf32, #tpu.memory_space<smem>>
    %122 = vector.broadcast %121 : f32 to vector<128x128xf32>
    %123 = arith.mulf %122, %120 : vector<128x128xf32>
    %124 = arith.addf %105, %123 : vector<128x128xf32>
    %c127_i32_40 = arith.constant 127 : i32
    %125 = tpu.dynamic_rotate %4 by %c127_i32_40 dim 1 : vector<128x128xf32>, i32 -> vector<128x128xf32>
    %c1_i32_41 = arith.constant 1 : i32
    %126 = vector.broadcast %c1_i32_41 : i32 to vector<1x128xi32>
    %127 = arith.addi %6, %126 : vector<1x128xi32>
    %c0_i32_42 = arith.constant 0 : i32
    %128 = vector.broadcast %c0_i32_42 : i32 to vector<1x128xi32>
    %129 = arith.cmpi sge, %127, %128 : vector<1x128xi32>
    %130 = vector.broadcast %85 : vector<128x1xi1> to vector<128x128xi1>
    %131 = vector.broadcast %129 : vector<1x128xi1> to vector<128x128xi1>
    %132 = arith.andi %130, %131 : vector<128x128xi1>
    %c1_i32_43 = arith.constant 1 : i32
    %133 = vector.broadcast %c1_i32_43 : i32 to vector<1x128xi32>
    %134 = arith.addi %6, %133 : vector<1x128xi32>
    %c128_i32_44 = arith.constant 128 : i32
    %135 = vector.broadcast %c128_i32_44 : i32 to vector<1x128xi32>
    %136 = arith.cmpi slt, %134, %135 : vector<1x128xi32>
    %137 = vector.broadcast %136 : vector<1x128xi1> to vector<128x128xi1>
    %138 = arith.andi %132, %137 : vector<128x128xi1>
    %cst_45 = arith.constant 0.000000e+00 : f32
    %139 = vector.broadcast %cst_45 : f32 to vector<128x128xf32>
    %140 = arith.select %138, %125, %139 : vector<128x128xi1>, vector<128x128xf32>
    %c5 = arith.constant 5 : index
    %141 = memref.load %arg1[%c5] : memref<11xf32, #tpu.memory_space<smem>>
    %142 = vector.broadcast %141 : f32 to vector<128x128xf32>
    %143 = arith.mulf %142, %140 : vector<128x128xf32>
    %144 = arith.addf %124, %143 : vector<128x128xf32>
    %c127_i32_46 = arith.constant 127 : i32
    %145 = tpu.dynamic_rotate %4 by %c127_i32_46 dim 0 : vector<128x128xf32>, i32 -> vector<128x128xf32>
    %c1_i32_47 = arith.constant 1 : i32
    %146 = vector.broadcast %c1_i32_47 : i32 to vector<128x1xi32>
    %147 = arith.addi %5, %146 : vector<128x1xi32>
    %c0_i32_48 = arith.constant 0 : i32
    %148 = vector.broadcast %c0_i32_48 : i32 to vector<128x1xi32>
    %149 = arith.cmpi sge, %147, %148 : vector<128x1xi32>
    %c1_i32_49 = arith.constant 1 : i32
    %150 = vector.broadcast %c1_i32_49 : i32 to vector<128x1xi32>
    %151 = arith.addi %5, %150 : vector<128x1xi32>
    %c128_i32_50 = arith.constant 128 : i32
    %152 = vector.broadcast %c128_i32_50 : i32 to vector<128x1xi32>
    %153 = arith.cmpi slt, %151, %152 : vector<128x1xi32>
    %154 = arith.andi %149, %153 : vector<128x1xi1>
    %c1_i32_51 = arith.constant 1 : i32
    %155 = tpu.dynamic_rotate %145 by %c1_i32_51 dim 1 : vector<128x128xf32>, i32 -> vector<128x128xf32>
    %c-1_i32_52 = arith.constant -1 : i32
    %156 = vector.broadcast %c-1_i32_52 : i32 to vector<1x128xi32>
    %157 = arith.addi %6, %156 : vector<1x128xi32>
    %c0_i32_53 = arith.constant 0 : i32
    %158 = vector.broadcast %c0_i32_53 : i32 to vector<1x128xi32>
    %159 = arith.cmpi sge, %157, %158 : vector<1x128xi32>
    %160 = vector.broadcast %154 : vector<128x1xi1> to vector<128x128xi1>
    %161 = vector.broadcast %159 : vector<1x128xi1> to vector<128x128xi1>
    %162 = arith.andi %160, %161 : vector<128x128xi1>
    %c-1_i32_54 = arith.constant -1 : i32
    %163 = vector.broadcast %c-1_i32_54 : i32 to vector<1x128xi32>
    %164 = arith.addi %6, %163 : vector<1x128xi32>
    %c128_i32_55 = arith.constant 128 : i32
    %165 = vector.broadcast %c128_i32_55 : i32 to vector<1x128xi32>
    %166 = arith.cmpi slt, %164, %165 : vector<1x128xi32>
    %167 = vector.broadcast %166 : vector<1x128xi1> to vector<128x128xi1>
    %168 = arith.andi %162, %167 : vector<128x128xi1>
    %cst_56 = arith.constant 0.000000e+00 : f32
    %169 = vector.broadcast %cst_56 : f32 to vector<128x128xf32>
    %170 = arith.select %168, %155, %169 : vector<128x128xi1>, vector<128x128xf32>
    %c6 = arith.constant 6 : index
    %171 = memref.load %arg1[%c6] : memref<11xf32, #tpu.memory_space<smem>>
    %172 = vector.broadcast %171 : f32 to vector<128x128xf32>
    %173 = arith.mulf %172, %170 : vector<128x128xf32>
    %174 = arith.addf %144, %173 : vector<128x128xf32>
    %c0_i32_57 = arith.constant 0 : i32
    %175 = vector.broadcast %c0_i32_57 : i32 to vector<1x128xi32>
    %176 = arith.addi %6, %175 : vector<1x128xi32>
    %c0_i32_58 = arith.constant 0 : i32
    %177 = vector.broadcast %c0_i32_58 : i32 to vector<1x128xi32>
    %178 = arith.cmpi sge, %176, %177 : vector<1x128xi32>
    %179 = vector.broadcast %154 : vector<128x1xi1> to vector<128x128xi1>
    %180 = vector.broadcast %178 : vector<1x128xi1> to vector<128x128xi1>
    %181 = arith.andi %179, %180 : vector<128x128xi1>
    %c0_i32_59 = arith.constant 0 : i32
    %182 = vector.broadcast %c0_i32_59 : i32 to vector<1x128xi32>
    %183 = arith.addi %6, %182 : vector<1x128xi32>
    %c128_i32_60 = arith.constant 128 : i32
    %184 = vector.broadcast %c128_i32_60 : i32 to vector<1x128xi32>
    %185 = arith.cmpi slt, %183, %184 : vector<1x128xi32>
    %186 = vector.broadcast %185 : vector<1x128xi1> to vector<128x128xi1>
    %187 = arith.andi %181, %186 : vector<128x128xi1>
    %cst_61 = arith.constant 0.000000e+00 : f32
    %188 = vector.broadcast %cst_61 : f32 to vector<128x128xf32>
    %189 = arith.select %187, %145, %188 : vector<128x128xi1>, vector<128x128xf32>
    %c7 = arith.constant 7 : index
    %190 = memref.load %arg1[%c7] : memref<11xf32, #tpu.memory_space<smem>>
    %191 = vector.broadcast %190 : f32 to vector<128x128xf32>
    %192 = arith.mulf %191, %189 : vector<128x128xf32>
    %193 = arith.addf %174, %192 : vector<128x128xf32>
    %c127_i32_62 = arith.constant 127 : i32
    %194 = tpu.dynamic_rotate %145 by %c127_i32_62 dim 1 : vector<128x128xf32>, i32 -> vector<128x128xf32>
    %c1_i32_63 = arith.constant 1 : i32
    %195 = vector.broadcast %c1_i32_63 : i32 to vector<1x128xi32>
    %196 = arith.addi %6, %195 : vector<1x128xi32>
    %c0_i32_64 = arith.constant 0 : i32
    %197 = vector.broadcast %c0_i32_64 : i32 to vector<1x128xi32>
    %198 = arith.cmpi sge, %196, %197 : vector<1x128xi32>
    %199 = vector.broadcast %154 : vector<128x1xi1> to vector<128x128xi1>
    %200 = vector.broadcast %198 : vector<1x128xi1> to vector<128x128xi1>
    %201 = arith.andi %199, %200 : vector<128x128xi1>
    %c1_i32_65 = arith.constant 1 : i32
    %202 = vector.broadcast %c1_i32_65 : i32 to vector<1x128xi32>
    %203 = arith.addi %6, %202 : vector<1x128xi32>
    %c128_i32_66 = arith.constant 128 : i32
    %204 = vector.broadcast %c128_i32_66 : i32 to vector<1x128xi32>
    %205 = arith.cmpi slt, %203, %204 : vector<1x128xi32>
    %206 = vector.broadcast %205 : vector<1x128xi1> to vector<128x128xi1>
    %207 = arith.andi %201, %206 : vector<128x128xi1>
    %cst_67 = arith.constant 0.000000e+00 : f32
    %208 = vector.broadcast %cst_67 : f32 to vector<128x128xf32>
    %209 = arith.select %207, %194, %208 : vector<128x128xi1>, vector<128x128xf32>
    %c8 = arith.constant 8 : index
    %210 = memref.load %arg1[%c8] : memref<11xf32, #tpu.memory_space<smem>>
    %211 = vector.broadcast %210 : f32 to vector<128x128xf32>
    %212 = arith.mulf %211, %209 : vector<128x128xf32>
    %213 = arith.addf %193, %212 : vector<128x128xf32>
    %c9 = arith.constant 9 : index
    %214 = memref.load %arg1[%c9] : memref<11xf32, #tpu.memory_space<smem>>
    %215 = vector.broadcast %214 : f32 to vector<128x128xf32>
    %216 = arith.addf %213, %215 : vector<128x128xf32>
    %c10 = arith.constant 10 : index
    %217 = memref.load %arg1[%c10] : memref<11xf32, #tpu.memory_space<smem>>
    %218 = math.tanh %216 : vector<128x128xf32>
    %219 = vector.broadcast %217 : f32 to vector<128x128xf32>
    %220 = arith.mulf %219, %218 : vector<128x128xf32>
    %c0_68 = arith.constant 0 : index
    %c0_69 = arith.constant 0 : index
    %221 = vector.load %arg5[%c0_68, %c0_69] : memref<128x128xf32, #tpu.memory_space<vmem>>, vector<128x128xf32>
    tpu.vector_store %arg5[%c0_68, %c0_69], %220 {strides = array<i32>} : memref<128x128xf32, #tpu.memory_space<vmem>>, vector<128x128xf32>,
    return
  }
  func.func @transform_0(%arg0: i32) -> i32 {
    %c0_i32 = arith.constant 0 : i32
    %c0_i32_0 = arith.constant 0 : i32
    return %c0_i32 : i32
  }
  func.func @transform_1(%arg0: i32) -> (i32, i32) {
    %c0_i32 = arith.constant 0 : i32
    %c0_i32_0 = arith.constant 0 : i32
    %c0_i32_1 = arith.constant 0 : i32
    return %c0_i32, %c0_i32_0 : i32, i32
  }
  func.func @transform_2(%arg0: i32) -> (i32, i32) {
    %c0_i32 = arith.constant 0 : i32
    %c0_i32_0 = arith.constant 0 : i32
    %c0_i32_1 = arith.constant 0 : i32
    return %c0_i32, %c0_i32_0 : i32, i32
  }
  func.func @transform_3(%arg0: i32) -> (i32, i32) {
    %c0_i32 = arith.constant 0 : i32
    %c0_i32_0 = arith.constant 0 : i32
    %c0_i32_1 = arith.constant 0 : i32
    return %c0_i32, %c0_i32_0 : i32, i32
  }
  func.func @transform_4(%arg0: i32) -> (i32, i32) {
    %c0_i32 = arith.constant 0 : i32
    %c0_i32_0 = arith.constant 0 : i32
    %c0_i32_1 = arith.constant 0 : i32
    return %c0_i32, %c0_i32_0 : i32, i32
  }
}

</mosaic_0001>

<bundles_post_ra>
// kernel: tpu_custom_call.1
= control target key start
LH: loop header
LB: loop body
LE: loop exit
PB: predicated region body
PF: predicated region fallthrough
CT: control target
= control target key end

     0   :  { %9 = vsyncpa [#allocation4], 0  ;;  %s3066_s0 = inlined_call_operand.vmem [shape: f32[11], index: 0, kind: input, shape index: {}]   ;;  %s3067_s1 = inlined_call_operand.vmem [shape: f32[128,16], index: 1, kind: input, shape index: {}]   ;;  %s3068_s2 = inlined_call_operand.vmem [shape: f32[16,16], index: 2, kind: input, shape index: {}]   ;;  %s3069_s3 = inlined_call_operand.vmem [shape: f32[16,128], index: 3, kind: input, shape index: {}]   ;;  %s3070_s4 = inlined_call_operand.hbm [shape: f32[128,128], index: 4, kind: output, shape index: {}]  }
   0x1   :  { %10 = vsyncpa [#allocation3], 0  ;;  %s17_s17 = sshll.u32 %s3066_s0, 4  ;;  %s18_s17 = int_to_ptr.vmem [resolvable:$true] %s17_s17 }
   0x2   :  { %s1845_s18 = scalar_lea.vmem %s18_s17, 16  ;;  %p1850_p1 = scmp.lt.s32.totalorder %s18_s17, %s18_s17 }
   0x3   :  { %p1846_p0 = scmp.ne.s32.totalorder %s18_s17, %s1845_s18  ;;  %p1851_p2 = scmp.lt.s32.totalorder %s1845_s18, %s1845_s18 }
   0x5   :  { %p1852_p3 = por %p1851_p2, %p1850_p1 }
   0x7   :  { %p1853_p4 = pnand %p1852_p3, %p1846_p0 }
   0x9   :  { %1856 = shalt.err (!%p1853_p4)
}
   0xa   :  { %s1881_s19 = smov [#allocation2]  }
   0xb   :  { %20 = dma.vmem_to_smem %s18_s17, 16, %s1881_s19, [#allocation4]  }
   0xc   :  { %1877 = dma.done.wait [#allocation4], 16  }
   0xd   :  { %1878 = vsyncadd [#allocation4], 4294967280 }
   0xe   :  { %30 = sfence }
   0xf   :  { %v34_v0 = vld [vmem:[%s3069_s3 + $0x8] sm:$0xff]  ;;  %v33_v1 = vld [vmem:[%s3069_s3] sm:$0xff]  ;;  %vm35_vm0 = vcmask 130048   ;;  %v123_v5 = vld [vmem:[%s3067_s1 + $0x30] sm:$0xff]  ;;  %s1739_s29 = sld [smem:[#allocation2 + $0x4]]  ;;  %v326_v22 = vlaneseq  ;;  %s1882_s30 = smov 1  }
  0x10   :  { %v31_v2 = vld [vmem:[%s3068_s2] sm:$0xff]  ;;  %1768 = vmatprep.subr.mxu0 %v34_v0  ;;  %v32_v3 = vld [vmem:[%s3068_s2 + $0x8] sm:$0xff]  ;;  %1788 = vmatprep.mubr.msk.f32.mxu1 %vm35_vm0, %v123_v5  ;;  %v124_v9 = vld [vmem:[%s3067_s1 + $0x38] sm:$0xff]  ;;  %s1742_s2 = sld [smem:[#allocation2 + $0x7]]  ;;  %s1883_s5 = smov 127  }
  0x11   :  { %1772 = vmatprep.mubr.msk.f32.mxu0 %vm35_vm0, %v31_v2  ;;  %1769 = vmatpush3.msra.mxu0 %v34_v0  ;;  %v117_v4 = vld [vmem:[%s3067_s1] sm:$0xff]  ;;  %v118_v8 = vld [vmem:[%s3067_s1 + $0x8] sm:$0xff]  ;;  %v119_v10 = vld [vmem:[%s3067_s1 + $0x10] sm:$0xff]  ;;  %v1994_v23 = vshrl.u32 %v326_v22, 7  ;;  %s561_s6 = sld [smem:[#allocation2]]  ;;  %s1884_s14 = smov [#allocation5]  }
  0x12   :  { %1770 = vmatprep.subr.mxu0 %v33_v1  ;;  %v125_v11 = vld [vmem:[%s3067_s1 + $0x40] sm:$0xff]  ;;  %v120_v12 = vld [vmem:[%s3067_s1 + $0x18] sm:$0xff]  ;;  %v126_v13 = vld [vmem:[%s3067_s1 + $0x48] sm:$0xff]  ;;  %s1737_s7 = sld [smem:[#allocation2 + $0x2]]  ;;  %s1706_s15 = sshll.u32 %s1884_s14, 4  ;;  %s1707_s15 = int_to_ptr.vmem [resolvable:$true] %s1706_s15 }
  0x13   :  { %1771 = vmatpush3.msra.mxu0 %v33_v1  ;;  %v121_v14 = vld [vmem:[%s3067_s1 + $0x20] sm:$0xff]  ;;  %v127_v15 = vld [vmem:[%s3067_s1 + $0x50] sm:$0xff]  ;;  %v122_v16 = vld [vmem:[%s3067_s1 + $0x28] sm:$0xff]  ;;  %vm1210_vm1 = vcmp.lt.s32.totalorder %v1994_v23, 7  ;;  %vm361_vm2 = vcmp.lt.s32.totalorder %v1994_v23, 1  ;;  %v342_v57 = vadd.s32 120, %v1994_v23  ;;  %p1862_p6 = scmp.lt.s32.totalorder %s1707_s15, %s1707_s15 }
  0x14   :  { %1773 = vmatmul.mubr.msk.f32.vlgmr.msra.gmra.mxu0 %vm35_vm0, %v32_v3  ;;  %v128_v17 = vld [vmem:[%s3067_s1 + $0x58] sm:$0xff]  ;;  %v129_v18 = vld [vmem:[%s3067_s1 + $0x60] sm:$0xff]  ;;  %v130_v19 = vld [vmem:[%s3067_s1 + $0x68] sm:$0xff]  ;;  %v2130_v5 = vadd.s32 4294967295, %v1994_v23  ;;  %s1738_s8 = sld [smem:[#allocation2 + $0x3]]  ;;  %s1857_s16 = scalar_lea.vmem %s1707_s15, 2048 }
  0x15   :  { %1779 = vmatprep.mubr.msk.f32.mxu0 %vm35_vm0, %v117_v4  ;;  %v131_v20 = vld [vmem:[%s3067_s1 + $0x70] sm:$0xff]  ;;  %v132_v21 = vld [vmem:[%s3067_s1 + $0x78] sm:$0xff]  ;;  %v2002_v26 = vstv %s1739_s29  ;;  %s1736_s1 = sld [smem:[#allocation2 + $0x1]]  ;;  %p1858_p5 = scmp.ne.s32.totalorder %s1707_s15, %s1857_s16 }
  0x16   :  { %v2017_v32 = vstv %s1742_s2  ;;  %3101 = vst [vmem:[#allocation15_spill] sm:$0xff] %v2130_v5  ;;  %vm394_vm3 = vcmp.ge.s32.totalorder %v2130_v5, 0  ;;  %s1740_s9 = sld [smem:[#allocation2 + $0x5]]  ;;  %p1863_p7 = scmp.lt.s32.totalorder %s1857_s16, %s1857_s16 }
  0x17   :  { %s2555_s10 = sld [smem:[#allocation2 + $0x6]] }
  0x18   :  { %s2590_s11 = sld [smem:[#allocation2 + $0x8]]  ;;  %p1864_p8 = por %p1863_p7, %p1862_p6 }
  0x19   :  { %s2610_s12 = sld [smem:[#allocation2 + $0x9]] }
  0x1a   :  { %s1745_s13 = sld [smem:[#allocation2 + $0xa]]  ;;  %p1865_p9 = pnand %p1864_p8, %p1858_p5 }
  0x1b   :  { %v2066_v46 = vstv %s1736_s1 }
  0xd4   :  { %v1774_v6 = vpop.f32.mrf.mxu0 }
  0xd5   :  { %1775 = vmatprep.subr.mxu0 %v1774_v6  ;;  %1803 = vmatprep.subr.mxu1 %v1774_v6 }
  0xd6   :  { %v108_v7 = vpop.f32.mrf.mxu0  ;;  %1776 = vmatpush3.msra.mxu0 %v1774_v6  ;;  %1805 = vmatpush3.msra.mxu1 %v1774_v6  ;;  %v2132_v6 = vadd.s32 1, %v342_v57 }
  0xd7   :  { %1777 = vmatprep.subr.mxu0 %v108_v7  ;;  %1804 = vmatprep.subr.mxu1 %v108_v7 }
  0xd8   :  { %1778 = vmatpush3.msra.mxu0 %v108_v7  ;;  %1806 = vmatpush3.msra.mxu1 %v108_v7  ;;  %3102 = vst [vmem:[#allocation16_spill] sm:$0xff] %v2132_v6  ;;  %vm1274_vm4 = vcmp.lt.s32.totalorder %v2132_v6, 128  ;;  %v2428_v6 = vstv %s561_s6 }
  0xd9   :  { %1780 = vmatmul.mubr.msk.f32.vlgmr.msra.gmra.mxu0 %vm35_vm0, %v118_v8  ;;  %1789 = vmatmul.mubr.msk.f32.vlgmr.msra.gmra.mxu1 %vm35_vm0, %v124_v9 }
  0xda   :  { %1782 = vmatprep.mubr.msk.f32.mxu0 %vm35_vm0, %v119_v10  ;;  %1791 = vmatprep.mubr.msk.f32.mxu1 %vm35_vm0, %v125_v11 }
  0xdd   :  { %1783 = vmatmul.mubr.msk.f32.gmra.mxu0 %vm35_vm0, %v120_v12  ;;  %1792 = vmatmul.mubr.msk.f32.gmra.mxu1 %vm35_vm0, %v126_v13 }
  0xde   :  { %1785 = vmatprep.mubr.msk.f32.mxu0 %vm35_vm0, %v121_v14  ;;  %1794 = vmatprep.mubr.msk.f32.mxu1 %vm35_vm0, %v127_v15 }
  0xe1   :  { %1786 = vmatmul.mubr.msk.f32.gmra.mxu0 %vm35_vm0, %v122_v16  ;;  %1795 = vmatmul.mubr.msk.f32.gmra.mxu1 %vm35_vm0, %v128_v17 }
  0xe2   :  { %1797 = vmatprep.mubr.msk.f32.mxu1 %vm35_vm0, %v129_v18 }
  0xe5   :  { %1798 = vmatmul.mubr.msk.f32.gmra.mxu1 %vm35_vm0, %v130_v19 }
  0xe6   :  { %1800 = vmatprep.mubr.msk.f32.mxu1 %vm35_vm0, %v131_v20 }
  0xe9   :  { %1801 = vmatmul.mubr.msk.f32.gmra.mxu1 %vm35_vm0, %v132_v21 }
 0x199   :  { %v1996_v24 = vpop.f32.mrf.mxu0  ;;  %v1998_v25 = vpop.f32.mrf.mxu1 }
 0x19a   :  { %854 = vrot.lane.b32.xlu1 %v1996_v24, %s1882_s30  ;;  %v1195_v31 = vrot.slane %v1996_v24, 1  ;;  %v346_v53 = vrot.slane %v1996_v24, 7  ;;  %v1201_v3 = vrot.slane %v1998_v25, 1  ;;  %v352_v15 = vrot.slane %v1998_v25, 7 }
 0x19b   :  { %v2004_v27 = vpop.f32.mrf.mxu0  ;;  %v2006_v28 = vpop.f32.mrf.mxu1 }
 0x19c   :  { %v2011_v29 = vmul.f32 %v2002_v26, %v2004_v27  ;;  %852 = vrot.lane.b32.xlu0 %v2004_v27, %s1882_s30  ;;  %v1194_v30 = vrot.slane %v2004_v27, 1  ;;  %v345_v49 = vrot.slane %v2004_v27, 7  ;;  %v1200_v50 = vrot.slane %v2006_v28, 1 }
 0x19d   :  { %v2019_v33 = vpop.f32.mrf.mxu0  ;;  %v2021_v34 = vpop.f32.mrf.mxu1  ;;  %v351_v54 = vrot.slane %v2006_v28, 7 }
 0x19e   :  { %3094 = vst [vmem:[#allocation8_spill] sm:$0xff] %v2011_v29  ;;  %v2025_v35 = vmul.f32 %v2021_v34, %v2002_v26  ;;  %866 = vrot.lane.b32.xlu1 %v1998_v25, %s1882_s30  ;;  %v2035_v36 = vsel %vm1210_vm1, %v1194_v30, %v1195_v31  ;;  %v354_v42 = vrot.slane %v2021_v34, 7  ;;  %v2103_v59 = vsel %vm361_vm2, %v345_v49, %v346_v53 }
 0x19f   :  { %v2037_v37 = vpop.f32.mrf.mxu1  ;;  %v2041_v38 = vmul.f32 %v2017_v32, %v2035_v36  ;;  %v2043_v39 = vpop.f32.mrf.mxu0  ;;  %v2156_v11 = vsel %vm1210_vm1, %v1200_v50, %v1201_v3  ;;  %v2202_v21 = vsel %vm361_vm2, %v351_v54, %v352_v15 }
 0x1a0   :  { %864 = vrot.lane.b32.xlu0 %v2006_v28, %s1882_s30  ;;  %v353_v45 = vrot.slane %v2037_v37, 7  ;;  %v1202_v57 = vrot.slane %v2037_v37, 1 }
 0x1a1   :  { %3095 = vst [vmem:[#allocation9_spill] sm:$0xff] %v2041_v38  ;;  %v2047_v40 = vpop.f32.mrf.mxu1  ;;  %v2058_v44 = vpop.f32.mrf.mxu0 }
 0x1a2   :  { %v2051_v41 = vmul.f32 %v2047_v40, %v2002_v26  ;;  %1082 = vrot.lane.b32.xlu1 %v1996_v24, %s1883_s5  ;;  %3097 = vst [vmem:[#allocation11_spill] sm:$0xff] %v2058_v44  ;;  %v2074_v47 = vsel %vm361_vm2, %v353_v45, %v354_v42  ;;  %v1199_v52 = vrot.slane %v2058_v44, 1  ;;  %v350_v56 = vrot.slane %v2058_v44, 7 }
 0x1a3   :  { %v2056_v43 = vpop.f32.mrf.mxu1  ;;  %v2082_v51 = vmul.f32 %v2066_v46, %v2074_v47  ;;  %v356_v62 = vrot.slane %v2047_v40, 7  ;;  %v1205_v1 = vrot.slane %v2047_v40, 1 }
 0x1a4   :  { %3096 = vst [vmem:[#allocation10_spill] sm:$0xff] %v2051_v41  ;;  %1080 = vrot.lane.b32.xlu0 %v2004_v27, %s1883_s5  ;;  %v2093_v55 = vsel %vm1210_vm1, %v1199_v52, %v1200_v50  ;;  %v2109_v60 = vsel %vm361_vm2, %v350_v56, %v351_v54  ;;  %v355_v61 = vrot.slane %v2056_v43, 7  ;;  %v1204_v0 = vrot.slane %v2056_v43, 1 }
 0x1a5   :  { %v2076_v48 = vpop.f32.mrf.mxu1  ;;  %3098 = vst [vmem:[#allocation12_spill] sm:$0xff] %v2093_v55  ;;  %v2230_v27 = vsel %vm361_vm2, %v352_v15, %v353_v45  ;;  %v1197_v45 = vrot.slane %v2019_v33, 1  ;;  %v1196_v50 = vrot.slane %v2043_v39, 1  ;;  %v1203_v54 = vrot.slane %v2021_v34, 1  ;;  %v2288_v15 = vpop.f32.mrf.mxu0 }
 0x1a6   :  { %1094 = vrot.lane.b32.xlu1 %v1998_v25, %s1883_s5  ;;  %v2119_v63 = vsel %vm361_vm2, %v355_v61, %v356_v62  ;;  %v2140_v7 = vsel %vm1210_vm1, %v1204_v0, %v1205_v1  ;;  %3108 = vst [vmem:[#allocation22_spill] sm:$0xff] %v2288_v15 }
 0x1a7   :  { %v2099_v58 = vpop.f32.mrf.mxu1  ;;  %3100 = vst [vmem:[#allocation14_spill] sm:$0xff] %v2119_v63  ;;  %3103 = vst [vmem:[#allocation17_spill] sm:$0xff] %v2140_v7 }
 0x1a8   :  { %1092 = vrot.lane.b32.xlu0 %v2006_v28, %s1883_s5  ;;  %3099 = vst [vmem:[#allocation13_spill] sm:$0xff] %v2099_v58  ;;  %v3074_v4 = vrot.slane %v2099_v58, 7  ;;  %v3073_v9 = vrot.slane %v2099_v58, 1 }
 0x1a9   :  { %v2125_v2 = vpop.f32.mrf.mxu1 }
 0x1aa   :  { %858 = vrot.lane.b32.xlu1 %v2019_v33, %s1882_s30  ;;  %v2146_v8 = vsel %vm361_vm2, %v356_v62, %v3074_v4  ;;  %v3072_v10 = vrot.slane %v2125_v2, 7  ;;  %v3071_v12 = vrot.slane %v2125_v2, 1  ;;  %v2167_v13 = vsel %vm1210_vm1, %v1205_v1, %v3073_v9 }
 0x1ab   :  { %3104 = vst [vmem:[#allocation18_spill] sm:$0xff] %v2146_v8  ;;  %3105 = vst [vmem:[#allocation19_spill] sm:$0xff] %v2167_v13  ;;  %v2268_v62 = vsel %vm1210_vm1, %v1202_v57, %v1203_v54  ;;  %v2284_v1 = vsel %vm1210_vm1, %v1195_v31, %v1196_v50  ;;  %v349_v31 = vrot.slane %v2288_v15, 7  ;;  %v2396_v9 = vsel %vm1210_vm1, %v1203_v54, %v1204_v0 }
 0x1ac   :  { %444 = vrot.lane.b32.xlu0 %v2103_v59, %s1882_s30  ;;  %v2173_v14 = vsel %vm361_vm2, %v3072_v10, %v345_v49  ;;  %v2182_v16 = vsel %vm1210_vm1, %v3071_v12, %v1194_v30  ;;  %v347_v30 = vrot.slane %v2043_v39, 7  ;;  %v348_v49 = vrot.slane %v2019_v33, 7  ;;  %3115 = vst [vmem:[#allocation29_spill] sm:$0xff] %v2396_v9 }
 0x1ad   :  { %v633_v17 = vsel %vm394_vm3, %v2173_v14, 0.0  ;;  %v1484_v18 = vsel %vm1274_vm4, %v2182_v16, 0.0 }
 0x1ae   :  { %870 = vrot.lane.b32.xlu1 %v2021_v34, %s1882_s30  ;;  %v2193_v19 = vmul.f32 %v2066_v46, %v633_v17  ;;  %v2198_v20 = vmul.f32 %v2017_v32, %v1484_v18  ;;  %v2335_v17 = vsel %vm361_vm2, %v354_v42, %v355_v61  ;;  %v2343_v18 = vsel %vm361_vm2, %v349_v31, %v350_v56 }
 0x1af   :  { %3109 = vst [vmem:[#allocation23_spill] sm:$0xff] %v2335_v17  ;;  %3110 = vst [vmem:[#allocation24_spill] sm:$0xff] %v2343_v18  ;;  %v1198_v56 = vrot.slane %v2288_v15, 1 }
 0x1b0   :  { %1291 = vrot.lane.b32.xlu0 %v2035_v36, %s1882_s30  ;;  %3106 = vst [vmem:[#allocation20_spill] sm:$0xff] %v2193_v19  ;;  %3107 = vst [vmem:[#allocation21_spill] sm:$0xff] %v2198_v20 }
 0x1b1   :  { %v2382_v12 = vsel %vm1210_vm1, %v1197_v45, %v1198_v56 }
 0x1b2   :  { %1086 = vrot.lane.b32.xlu1 %v2019_v33, %s1883_s5  ;;  %3114 = vst [vmem:[#allocation28_spill] sm:$0xff] %v2382_v12 }
 0x1b4   :  { %1303 = vrot.lane.b32.xlu0 %v2156_v11, %s1882_s30 }
 0x1b6   :  { %1098 = vrot.lane.b32.xlu1 %v2021_v34, %s1883_s5 }
 0x1b8   :  { %1519 = vrot.lane.b32.xlu0 %v2035_v36, %s1883_s5  ;;  %v2239_v36 = vsel %vm361_vm2, %v346_v53, %v347_v30  ;;  %v2258_v53 = vsel %vm1210_vm1, %v1196_v50, %v1197_v45 }
 0x1ba   :  { %456 = vrot.lane.b32.xlu1 %v2202_v21, %s1882_s30 }
 0x1bc   :  { %1531 = vrot.lane.b32.xlu0 %v2156_v11, %s1883_s5 }
 0x1be   :  { %685 = vrot.lane.b32.xlu1 %v2103_v59, %s1883_s5 }
 0x1c0   :  { %856 = vrot.lane.b32.xlu0 %v2043_v39, %s1882_s30 }
 0x1c2   :  { %697 = vrot.lane.b32.xlu1 %v2202_v21, %s1883_s5 }
 0x1c4   :  { %868 = vrot.lane.b32.xlu0 %v2037_v37, %s1882_s30 }
 0x1c6   :  { %862 = vrot.lane.b32.xlu1 %v2058_v44, %s1882_s30 }
 0x1c8   :  { %1084 = vrot.lane.b32.xlu0 %v2043_v39, %s1883_s5 }
 0x1ca   :  { %874 = vrot.lane.b32.xlu1 %v2047_v40, %s1882_s30 }
 0x1cc   :  { %1096 = vrot.lane.b32.xlu0 %v2037_v37, %s1883_s5 }
 0x1ce   :  { %1090 = vrot.lane.b32.xlu1 %v2058_v44, %s1883_s5 }
 0x1d0   :  { %458 = vrot.lane.b32.xlu0 %v2230_v27, %s1882_s30 }
 0x1d2   :  { %1102 = vrot.lane.b32.xlu1 %v2047_v40, %s1883_s5  ;;  %v2251_v40 = vsel %vm361_vm2, %v347_v30, %v348_v49 }
 0x1d4   :  { %687 = vrot.lane.b32.xlu0 %v2239_v36, %s1883_s5 }
 0x1d6   :  { %446 = vrot.lane.b32.xlu1 %v2239_v36, %s1882_s30 }
 0x1d8   :  { %699 = vrot.lane.b32.xlu0 %v2230_v27, %s1883_s5 }
 0x1da   :  { %448 = vrot.lane.b32.xlu1 %v2251_v40, %s1882_s30 }
 0x1dc   :  { %1295 = vrot.lane.b32.xlu0 %v2258_v53, %s1882_s30 }
 0x1de   :  { %460 = vrot.lane.b32.xlu1 %v2074_v47, %s1882_s30 }
 0x1e0   :  { %1307 = vrot.lane.b32.xlu0 %v2268_v62, %s1882_s30 }
 0x1e2   :  { %689 = vrot.lane.b32.xlu1 %v2251_v40, %s1883_s5 }
 0x1e4   :  { %1523 = vrot.lane.b32.xlu0 %v2258_v53, %s1883_s5 }
 0x1e6   :  { %701 = vrot.lane.b32.xlu1 %v2074_v47, %s1883_s5  ;;  %v2296_v47 = vsel %vm1210_vm1, %v1201_v3, %v1202_v57  ;;  %v2323_v3 = vsel %vm361_vm2, %v348_v49, %v349_v31  ;;  %v2366_v49 = vsel %vm1210_vm1, %v1198_v56, %v1199_v52  ;;  %v344_v56 = vand.u32 127, %v326_v22 }
 0x1e7   :  { %3112 = vst [vmem:[#allocation26_spill] sm:$0xff] %v2366_v49 }
 0x1e8   :  { %1535 = vrot.lane.b32.xlu0 %v2268_v62, %s1883_s5  ;;  %v2413_v0 = vadd.s32 4294967295, %v344_v56 }
 0x1ea   :  { %1293 = vrot.lane.b32.xlu1 %v2284_v1, %s1882_s30  ;;  %vm475_vm5 = vcmp.ge.s32.totalorder %v2413_v0, 0 }
 0x1eb   :  { %vm510_vm7 = vmand %vm394_vm3, %vm475_vm5 }
 0x1ec   :  { %860 = vrot.lane.b32.xlu0 %v2288_v15, %s1882_s30  ;;  %vm2992_vm9 = vmand %vm1274_vm4, %vm475_vm5 }
 0x1ee   :  { %1305 = vrot.lane.b32.xlu1 %v2296_v47, %s1882_s30 }
 0x1f0   :  { %872 = vrot.lane.b32.xlu0 %v2056_v43, %s1882_s30 }
 0x1f2   :  { %1521 = vrot.lane.b32.xlu1 %v2284_v1, %s1883_s5 }
 0x1f4   :  { %1088 = vrot.lane.b32.xlu0 %v2288_v15, %s1883_s5 }
 0x1f6   :  { %1533 = vrot.lane.b32.xlu1 %v2296_v47, %s1883_s5 }
 0x1f8   :  { %1100 = vrot.lane.b32.xlu0 %v2056_v43, %s1883_s5 }
 0x1fa   :  { %1301 = vrot.lane.b32.xlu1 %v2093_v55, %s1882_s30 }
 0x1fc   :  { %454 = vrot.lane.b32.xlu0 %v2109_v60, %s1882_s30 }
 0x1fe   :  { %1529 = vrot.lane.b32.xlu1 %v2093_v55, %s1883_s5 }
 0x200   :  { %695 = vrot.lane.b32.xlu0 %v2109_v60, %s1883_s5 }
 0x202   :  { %878 = vrot.lane.b32.xlu1 %v2076_v48, %s1882_s30 }
 0x204   :  { %450 = vrot.lane.b32.xlu0 %v2323_v3, %s1882_s30 }
 0x206   :  { %1106 = vrot.lane.b32.xlu1 %v2076_v48, %s1883_s5 }
 0x208   :  { %462 = vrot.lane.b32.xlu0 %v2335_v17, %s1882_s30 }
 0x20a   :  { %452 = vrot.lane.b32.xlu1 %v2343_v18, %s1882_s30 }
 0x20c   :  { %v855_v30 = vpop.permute.xlu1 %854  ;;  %691 = vrot.lane.b32.xlu0 %v2323_v3, %s1883_s5 }
 0x20d   :  { %v949_v41 = vsel %vm475_vm5, %v855_v30, 0.0  ;;  %v3121_v30 = vrot.slane %v2076_v48, 1 }
 0x20e   :  { %v2349_v34 = vpop.permute.xlu0 %852  ;;  %464 = vrot.lane.b32.xlu1 %v2119_v63, %s1882_s30 }
 0x20f   :  { %3111 = vst [vmem:[#allocation25_spill] sm:$0xff] %v2349_v34 }
 0x210   :  { %v2353_v42 = vpop.permute.xlu1 %866  ;;  %703 = vrot.lane.b32.xlu0 %v2335_v17, %s1883_s5 }
 0x212   :  { %v2358_v61 = vpop.permute.xlu0 %864  ;;  %693 = vrot.lane.b32.xlu1 %v2343_v18, %s1883_s5 }
 0x214   :  { %v2368_v50 = vpop.permute.xlu1 %1082  ;;  %1299 = vrot.lane.b32.xlu0 %v2366_v49, %s1882_s30 }
 0x216   :  { %v2372_v57 = vpop.permute.xlu0 %1080  ;;  %705 = vrot.lane.b32.xlu1 %v2119_v63, %s1883_s5 }
 0x217   :  { %3113 = vst [vmem:[#allocation27_spill] sm:$0xff] %v2372_v57  ;;  %v2432_v57 = vadd.s32 1, %v344_v56  ;;  %v3119_v56 = vrot.slane %v2099_v58, 7 }
 0x218   :  { %v2376_v31 = vpop.permute.xlu1 %1094  ;;  %1311 = vrot.lane.b32.xlu0 %v2140_v7, %s1882_s30 }
 0x219   :  { %vm735_vm6 = vcmp.lt.s32.totalorder %v2432_v57, 128 }
 0x21a   :  { %v2384_v52 = vpop.permute.xlu0 %1092  ;;  %1297 = vrot.lane.b32.xlu1 %v2382_v12, %s1882_s30  ;;  %vm738_vm8 = vmand %vm394_vm3, %vm735_vm6 }
 0x21b   :  { %vm3036_vm10 = vmand %vm1274_vm4, %vm735_vm6 }
 0x21c   :  { %v2388_v10 = vpop.permute.xlu1 %858  ;;  %1527 = vrot.lane.b32.xlu0 %v2366_v49, %s1883_s5 }
 0x21e   :  { %v445_v4 = vpop.permute.xlu0 %444  ;;  %1309 = vrot.lane.b32.xlu1 %v2396_v9, %s1882_s30 }
 0x220   :  { %v2400_v45 = vpop.permute.xlu1 %870  ;;  %1539 = vrot.lane.b32.xlu0 %v2140_v7, %s1883_s5  ;;  %v652_v7 = vmul.f32 %v2066_v46, %v2103_v59 }
 0x222   :  { %v2405_v20 = vpop.permute.xlu0 %1291  ;;  %1525 = vrot.lane.b32.xlu1 %v2382_v12, %s1883_s5  ;;  %v3118_v12 = vrot.slane %v2076_v48, 7 }
 0x223   :  { %3116 = vst [vmem:[#allocation30_spill] sm:$0xff] %v2405_v20  ;;  %v546_v20 = vsel %vm475_vm5, %v445_v4, 0.0  ;;  %v2444_v4 = vstv %s1737_s7 }
 0x224   :  { %v2409_v38 = vpop.permute.xlu1 %1086  ;;  %876 = vrot.lane.b32.xlu0 %v2099_v58, %s1882_s30  ;;  %v564_v5 = vmul.f32 %v2428_v6, %v546_v20  ;;  %v2452_v20 = vstv %s1738_s8  ;;  %v2464_v55 = vsel %vm361_vm2, %v3119_v56, %v3118_v12  ;;  %v658_v12 = vmul.f32 %v2066_v46, %v2202_v21 }
 0x225   :  { %3120 = vst [vmem:[#allocation32_spill] sm:$0xff] %v2464_v55  ;;  %v955_v56 = vsel %vm475_vm5, %v2353_v42, 0.0  ;;  %v2498_v42 = vpop.f32.mrf.mxu1 }
 0x226   :  { %v2415_v54 = vpop.permute.xlu0 %1303  ;;  %1537 = vrot.lane.b32.xlu1 %v2396_v9, %s1883_s5  ;;  %v668_v59 = vadd.f32 %v652_v7, %v564_v5  ;;  %v967_v5 = vmul.f32 %v2452_v20, %v949_v41  ;;  %v1049_v41 = vmul.f32 %v1996_v24, %v2002_v26  ;;  %3123 = vst [vmem:[#allocation33_spill] sm:$0xff] %v2498_v42 }
 0x227   :  { %v973_v18 = vmul.f32 %v2452_v20, %v955_v56 }
 0x228   :  { %v2419_v22 = vpop.permute.xlu1 %1098  ;;  %1104 = vrot.lane.b32.xlu0 %v2099_v58, %s1883_s5 }
 0x22a   :  { %v2424_v29 = vpop.permute.xlu0 %1519  ;;  %882 = vrot.lane.b32.xlu1 %v2125_v2, %s1882_s30 }
 0x22b   :  { %3117 = vst [vmem:[#allocation31_spill] sm:$0xff] %v2424_v29 }
 0x22c   :  { %v457_v19 = vpop.permute.xlu1 %456  ;;  %466 = vrot.lane.b32.xlu0 %v2146_v8, %s1882_s30 }
 0x22d   :  { %v552_v9 = vsel %vm475_vm5, %v457_v19, 0.0 }
 0x22e   :  { %v2438_v29 = vpop.permute.xlu0 %1531  ;;  %1110 = vrot.lane.b32.xlu1 %v2125_v2, %s1883_s5  ;;  %v570_v49 = vmul.f32 %v2428_v6, %v552_v9 }
 0x230   :  { %v686_v34 = vpop.permute.xlu1 %685  ;;  %707 = vrot.lane.b32.xlu0 %v2146_v8, %s1883_s5 }
 0x231   :  { %v755_v19 = vsel %vm735_vm6, %v686_v34, 0.0  ;;  %v3122_v34 = vrot.slane %v2099_v58, 1 }
 0x232   :  { %v773_v8 = vmul.f32 %v2444_v4, %v755_v19  ;;  %v857_v44 = vpop.permute.xlu0 %856  ;;  %468 = vrot.lane.b32.xlu1 %v2464_v55, %s1882_s30  ;;  %v2486_v19 = vstv %s1740_s9 }
 0x233   :  { %v2476_v63 = vsel %vm1210_vm1, %v3122_v34, %v3121_v30  ;;  %v1145_v30 = vsel %vm735_vm6, %v2368_v50, 0.0 }
 0x234   :  { %v789_v7 = vadd.f32 %v773_v8, %v668_v59  ;;  %v698_v9 = vpop.permute.xlu1 %697  ;;  %1315 = vrot.lane.b32.xlu0 %v2476_v63, %s1882_s30  ;;  %v674_v8 = vadd.f32 %v658_v12, %v570_v49  ;;  %v1163_v50 = vmul.f32 %v2486_v19, %v1145_v30  ;;  %v1151_v49 = vsel %vm735_vm6, %v2376_v31, 0.0 }
 0x235   :  { %v761_v21 = vsel %vm735_vm6, %v698_v9, 0.0  ;;  %v1055_v12 = vmul.f32 %v1998_v25, %v2002_v26  ;;  %v1169_v56 = vmul.f32 %v2486_v19, %v1151_v49  ;;  %v359_v31 = vrot.slane %v2498_v42, 7 }
 0x236   :  { %v983_v59 = vadd.f32 %v967_v5, %v789_v7  ;;  %v779_v34 = vmul.f32 %v2444_v4, %v761_v21  ;;  %v869_v58 = vpop.permute.xlu0 %868  ;;  %709 = vrot.lane.b32.xlu1 %v2464_v55, %s1883_s5  ;;  %v3126_v49 = vrot.slane %v2076_v48, 7 }
 0x238   :  { %v795_v17 = vadd.f32 %v779_v34, %v674_v8  ;;  %v2502_v15 = vpop.permute.xlu1 %862  ;;  %880 = vrot.lane.b32.xlu0 %v2498_v42, %s1882_s30  ;;  %v1065_v24 = vadd.f32 %v1049_v41, %v983_v59  ;;  %v3125_v34 = vrot.slane %v2125_v2, 7 }
 0x23a   :  { %v989_v5 = vadd.f32 %v973_v18, %v795_v17  ;;  %v1085_v7 = vpop.permute.xlu0 %1084  ;;  %1313 = vrot.lane.b32.xlu1 %v2167_v13, %s1882_s30  ;;  %v2513_v9 = vadd.f32 %v1163_v50, %v1065_v24  ;;  %v2541_v50 = vsel %vm361_vm2, %v359_v31, %v3125_v34  ;;  %v950_v34 = vsel %vm475_vm5, %v857_v44, 0.0 }
 0x23b   :  { %v968_v44 = vmul.f32 %v2452_v20, %v950_v34  ;;  %v1146_v34 = vsel %vm735_vm6, %v1085_v7, 0.0 }
 0x23c   :  { %v2516_v30 = vpop.permute.xlu1 %874  ;;  %1108 = vrot.lane.b32.xlu0 %v2498_v42, %s1883_s5  ;;  %v1071_v21 = vadd.f32 %v1055_v12, %v989_v5  ;;  %v2549_v12 = vsel %vm361_vm2, %v3126_v49, %v359_v31  ;;  %v659_v31 = vmul.f32 %v2066_v46, %v2230_v27 }
 0x23e   :  { %v1097_v41 = vpop.permute.xlu0 %1096  ;;  %1541 = vrot.lane.b32.xlu1 %v2167_v13, %s1883_s5  ;;  %v2522_v25 = vadd.f32 %v1169_v56, %v1071_v21  ;;  %v1208_v56 = vrot.slane %v2498_v42, 1 }
 0x240   :  { %v2524_v17 = vpop.permute.xlu1 %1090  ;;  %442 = vrot.lane.b32.xlu0 %v2173_v14, %s1882_s30 }
 0x242   :  { %v459_v18 = vpop.permute.xlu0 %458  ;;  %1321 = vrot.lane.b32.xlu1 %v2182_v16, %s1882_s30 }
 0x243   :  { %v553_v59 = vsel %vm475_vm5, %v459_v18, 0.0 }
 0x244   :  { %v2531_v8 = vpop.permute.xlu1 %1102  ;;  %683 = vrot.lane.b32.xlu0 %v2173_v14, %s1883_s5  ;;  %v571_v14 = vmul.f32 %v2428_v6, %v553_v59  ;;  %v653_v59 = vmul.f32 %v2066_v46, %v2239_v36 }
 0x245   :  { %3124 = vst [vmem:[#allocation34_spill] sm:$0xff] %v2531_v8 }
 0x246   :  { %v688_v24 = vpop.permute.xlu0 %687  ;;  %472 = vrot.lane.b32.xlu1 %v2541_v50, %s1882_s30  ;;  %v675_v13 = vadd.f32 %v659_v31, %v571_v14 }
 0x247   :  { %v756_v21 = vsel %vm735_vm6, %v688_v24, 0.0  ;;  %v956_v24 = vsel %vm475_vm5, %v869_v58, 0.0 }
 0x248   :  { %v447_v5 = vpop.permute.xlu1 %446  ;;  %470 = vrot.lane.b32.xlu0 %v2549_v12, %s1882_s30  ;;  %v774_v27 = vmul.f32 %v2444_v4, %v756_v21 }
 0x249   :  { %v547_v18 = vsel %vm475_vm5, %v447_v5, 0.0 }
 0x24a   :  { %v565_v49 = vmul.f32 %v2428_v6, %v547_v18  ;;  %v700_v42 = vpop.permute.xlu0 %699  ;;  %713 = vrot.lane.b32.xlu1 %v2541_v50, %s1883_s5  ;;  %v3127_v18 = vrot.slane %v2076_v48, 1 }
 0x24b   :  { %v762_v5 = vsel %vm735_vm6, %v700_v42, 0.0  ;;  %v974_v42 = vmul.f32 %v2452_v20, %v956_v24  ;;  %v1050_v24 = vmul.f32 %v2002_v26, %v2043_v39 }
 0x24c   :  { %v669_v55 = vadd.f32 %v653_v59, %v565_v49  ;;  %v780_v36 = vmul.f32 %v2444_v4, %v762_v5  ;;  %v449_v8 = vpop.permute.xlu1 %448  ;;  %711 = vrot.lane.b32.xlu0 %v2549_v12, %s1883_s5  ;;  %v2583_v58 = vsel %vm1210_vm1, %v3127_v18, %v1208_v56  ;;  %v1152_v49 = vsel %vm735_vm6, %v1097_v41, 0.0 }
 0x24d   :  { %v548_v31 = vsel %vm475_vm5, %v449_v8, 0.0  ;;  %v1170_v39 = vmul.f32 %v2486_v19, %v1152_v49 }
 0x24e   :  { %v790_v14 = vadd.f32 %v774_v27, %v669_v55  ;;  %v796_v21 = vadd.f32 %v780_v36, %v675_v13  ;;  %v1296_v59 = vpop.permute.xlu0 %1295  ;;  %1317 = vrot.lane.b32.xlu1 %v2583_v58, %s1882_s30  ;;  %v1056_v55 = vmul.f32 %v2002_v26, %v2037_v37  ;;  %v654_v27 = vmul.f32 %v2066_v46, %v2251_v40 }
 0x24f   :  { %v2605_v36 = vstv %s2555_s10  ;;  %v566_v7 = vmul.f32 %v2428_v6, %v548_v31  ;;  %v1389_v41 = vsel %vm475_vm5, %v1296_v59, 0.0  ;;  %v1164_v37 = vmul.f32 %v2486_v19, %v1146_v34 }
 0x250   :  { %v984_v13 = vadd.f32 %v968_v44, %v790_v14  ;;  %v990_v8 = vadd.f32 %v974_v42, %v796_v21  ;;  %v461_v5 = vpop.permute.xlu1 %460  ;;  %1543 = vrot.lane.b32.xlu0 %v2476_v63, %s1883_s5  ;;  %v951_v40 = vsel %vm475_vm5, %v2388_v10, 0.0  ;;  %v3128_v31 = vrot.slane %v2125_v2, 1 }
 0x251   :  { %v554_v14 = vsel %vm475_vm5, %v461_v5, 0.0  ;;  %v1407_v49 = vmul.f32 %v2605_v36, %v1389_v41  ;;  %v670_v23 = vadd.f32 %v654_v27, %v566_v7  ;;  %v2648_v27 = vstv %s2590_s11 }
 0x252   :  { %v1066_v44 = vadd.f32 %v1050_v24, %v984_v13  ;;  %v1072_v18 = vadd.f32 %v1056_v55, %v990_v8  ;;  %v1308_v42 = vpop.permute.xlu0 %1307  ;;  %1545 = vrot.lane.b32.xlu1 %v2583_v58, %s1883_s5  ;;  %v2627_v59 = vsel %vm1210_vm1, %v1208_v56, %v3128_v31  ;;  %v1489_v13 = vmul.f32 %v2017_v32, %v2258_v53 }
 0x253   :  { %v1395_v21 = vsel %vm475_vm5, %v1308_v42, 0.0  ;;  %v1495_v8 = vmul.f32 %v2017_v32, %v2268_v62  ;;  %v572_v41 = vmul.f32 %v2428_v6, %v554_v14  ;;  %v969_v53 = vmul.f32 %v2452_v20, %v951_v40 }
 0x254   :  { %v1180_v34 = vadd.f32 %v1164_v37, %v1066_v44  ;;  %v1186_v24 = vadd.f32 %v1170_v39, %v1072_v18  ;;  %v1413_v55 = vmul.f32 %v2605_v36, %v1395_v21  ;;  %v690_v10 = vpop.permute.xlu1 %689  ;;  %1319 = vrot.lane.b32.xlu0 %v2627_v59, %s1882_s30  ;;  %v957_v62 = vsel %vm475_vm5, %v2400_v45, 0.0 }
 0x255   :  { %v757_v56 = vsel %vm735_vm6, %v690_v10, 0.0  ;;  %v1051_v40 = vmul.f32 %v2019_v33, %v2002_v26  ;;  %v1147_v45 = vsel %vm735_vm6, %v2409_v38, 0.0  ;;  %v2661_v31 = vstv %s2610_s12 }
 0x256   :  { %v1423_v5 = vadd.f32 %v1407_v49, %v1180_v34  ;;  %v1429_v37 = vadd.f32 %v1413_v55, %v1186_v24  ;;  %v775_v39 = vmul.f32 %v2444_v4, %v757_v56  ;;  %v1524_v44 = vpop.permute.xlu0 %1523  ;;  %1549 = vrot.lane.b32.xlu1 %v2182_v16, %s1883_s5  ;;  %v676_v49 = vadd.f32 %v2082_v51, %v572_v41 }
 0x257   :  { %v1585_v7 = vsel %vm735_vm6, %v1524_v44, 0.0  ;;  %v1153_v51 = vsel %vm735_vm6, %v2419_v22, 0.0 }
 0x258   :  { %v791_v18 = vadd.f32 %v775_v39, %v670_v23  ;;  %v1505_v42 = vadd.f32 %v1489_v13, %v1423_v5  ;;  %v1603_v14 = vmul.f32 %v2648_v27, %v1585_v7  ;;  %v702_v21 = vpop.permute.xlu1 %701  ;;  %1547 = vrot.lane.b32.xlu0 %v2627_v59, %s1883_s5  ;;  %v1511_v16 = vadd.f32 %v1495_v8, %v1429_v37 }
 0x259   :  { %v763_v34 = vsel %vm735_vm6, %v702_v21, 0.0  ;;  %v975_v8 = vmul.f32 %v2452_v20, %v957_v62  ;;  %v1165_v39 = vmul.f32 %v2486_v19, %v1147_v45 }
 0x25a   :  { %v985_v24 = vadd.f32 %v969_v53, %v791_v18  ;;  %v1619_v55 = vadd.f32 %v1603_v14, %v1505_v42  ;;  %v781_v10 = vmul.f32 %v2444_v4, %v763_v34  ;;  %v1536_v13 = vpop.permute.xlu0 %1535  ;;  %v1171_v42 = vmul.f32 %v2486_v19, %v1153_v51 }
 0x25b   :  { %v1591_v33 = vsel %vm735_vm6, %v1536_v13, 0.0 }
 0x25c   :  { %v1637_v23 = vadd.f32 %v2661_v31, %v1619_v55  ;;  %v797_v38 = vadd.f32 %v781_v10, %v676_v49  ;;  %v1609_v56 = vmul.f32 %v2648_v27, %v1591_v33  ;;  %v1294_v5 = vpop.permute.xlu1 %1293  ;;  %v1067_v37 = vadd.f32 %v1051_v40, %v985_v24 }
 0x25d   :  { %v1388_v41 = vsel %vm475_vm5, %v1294_v5, 0.0  ;;  %v1488_v24 = vmul.f32 %v2017_v32, %v2284_v1 }
 0x25e   :  { %1813 = vtanh.f32 %v1637_v23  ;;  %v991_v44 = vadd.f32 %v975_v8, %v797_v38  ;;  %v1625_v53 = vadd.f32 %v1609_v56, %v1511_v16  ;;  %v1406_v62 = vmul.f32 %v2605_v36, %v1388_v41  ;;  %v2679_v7 = vpop.permute.xlu0 %860 }
 0x25f   :  { %v2681_v18 = vadd.f32 %v1165_v39, %v1067_v37  ;;  %v2704_v56 = vstv %s1745_s13 }
 0x260   :  { %v1643_v14 = vadd.f32 %v2661_v31, %v1625_v53  ;;  %v1306_v21 = vpop.permute.xlu1 %1305  ;;  %v1073_v40 = vadd.f32 %v2025_v35, %v991_v44  ;;  %v1422_v16 = vadd.f32 %v1406_v62, %v2513_v9  ;;  %v1494_v9 = vmul.f32 %v2017_v32, %v2296_v47 }
 0x261   :  { %v1394_v22 = vsel %vm475_vm5, %v1306_v21, 0.0 }
 0x262   :  { %1815 = vtanh.f32 %v1643_v14  ;;  %v1412_v45 = vmul.f32 %v2605_v36, %v1394_v22  ;;  %v2690_v34 = vpop.permute.xlu0 %872  ;;  %v2692_v49 = vadd.f32 %v1171_v42, %v1073_v40  ;;  %v1504_v13 = vadd.f32 %v1488_v24, %v1422_v16 }
 0x263   :  { %v657_v16 = vmul.f32 %v2066_v46, %v2109_v60  ;;  %v954_v24 = vsel %vm475_vm5, %v2358_v61, 0.0  ;;  %v1150_v60 = vsel %vm735_vm6, %v2384_v52, 0.0 }
 0x264   :  { %v1522_v55 = vpop.permute.xlu1 %1521  ;;  %v1428_v10 = vadd.f32 %v1412_v45, %v2522_v25 }
 0x265   :  { %v1584_v35 = vsel %vm735_vm6, %v1522_v55, 0.0 }
 0x266   :  { %v1602_v8 = vmul.f32 %v2648_v27, %v1584_v35  ;;  %v2700_v33 = vpop.permute.xlu0 %1088  ;;  %v1510_v37 = vadd.f32 %v1494_v9, %v1428_v10 }
 0x268   :  { %v1618_v23 = vadd.f32 %v1602_v8, %v1504_v13  ;;  %v1534_v38 = vpop.permute.xlu1 %1533  ;;  %v972_v8 = vmul.f32 %v2452_v20, %v954_v24 }
 0x269   :  { %v1590_v1 = vsel %vm735_vm6, %v1534_v38, 0.0  ;;  %v1054_v38 = vmul.f32 %v2002_v26, %v2006_v28  ;;  %v1589_v28 = vsel %vm735_vm6, %v2438_v29, 0.0  ;;  %v952_v29 = vsel %vm475_vm5, %v2679_v7, 0.0 }
 0x26a   :  { %v1636_v5 = vadd.f32 %v2661_v31, %v1618_v23  ;;  %v1608_v25 = vmul.f32 %v2648_v27, %v1590_v1  ;;  %v2710_v39 = vpop.permute.xlu0 %1100 }
 0x26b   :  { %v1814_v51 = vpop.eup %1813 }
 0x26c   :  { %v1671_v41 = vmul.f32 %v1814_v51, %v2704_v56  ;;  %1817 = vtanh.f32 %v1636_v5  ;;  %v1624_v44 = vadd.f32 %v1608_v25, %v1510_v37  ;;  %v2713_v47 = vpop.permute.xlu1 %1301  ;;  %v1393_v37 = vsel %vm475_vm5, %v2415_v54, 0.0 }
 0x26d   :  { %v1168_v51 = vmul.f32 %v2486_v19, %v1150_v60 }
 0x26e   :  { %1687 = vst [vmem:[#allocation5 + $0x10] sm:$0xff] %v1671_v41  ;;  %v1642_v53 = vadd.f32 %v2661_v31, %v1624_v44  ;;  %v455_v62 = vpop.permute.xlu0 %454 }
 0x26f   :  { %v1816_v42 = vpop.eup %1815  ;;  %v551_v14 = vsel %vm475_vm5, %v455_v62, 0.0 }
 0x270   :  { %v1677_v21 = vmul.f32 %v1816_v42, %v2704_v56  ;;  %1819 = vtanh.f32 %v1642_v53  ;;  %v569_v40 = vmul.f32 %v2428_v6, %v551_v14  ;;  %v2720_v22 = vpop.permute.xlu1 %1529  ;;  %v1411_v53 = vmul.f32 %v2605_v36, %v1393_v37 }
 0x272   :  { %1693 = vst [vmem:[#allocation5 + $0x40] sm:$0xff] %v1677_v21  ;;  %v696_v45 = vpop.permute.xlu0 %695  ;;  %v673_v35 = vadd.f32 %v657_v16, %v569_v40  ;;  %v1058_v21 = vmul.f32 %v2002_v26, %v2056_v43  ;;  %v1493_v40 = vmul.f32 %v2017_v32, %v2156_v11  ;;  %v655_v16 = vmul.f32 %v2066_v46, %v2323_v3 }
 0x273   :  { %v760_v55 = vsel %vm735_vm6, %v696_v45, 0.0  ;;  %v958_v3 = vsel %vm475_vm5, %v2690_v34, 0.0 }
 0x274   :  { %v778_v10 = vmul.f32 %v2444_v4, %v760_v55  ;;  %v2730_v13 = vpop.permute.xlu1 %878 }
 0x276   :  { %v794_v9 = vadd.f32 %v778_v10, %v673_v35  ;;  %v451_v23 = vpop.permute.xlu0 %450  ;;  %v3129_v10 = vld [vmem:[#allocation22_spill] sm:$0xff] }
 0x277   :  { %v549_v25 = vsel %vm475_vm5, %v451_v23, 0.0  ;;  %v1052_v11 = vmul.f32 %v2002_v26, %v3129_v10 }
 0x278   :  { %v988_v61 = vadd.f32 %v972_v8, %v794_v9  ;;  %v2738_v1 = vpop.permute.xlu1 %1106  ;;  %v567_v42 = vmul.f32 %v2428_v6, %v549_v25  ;;  %v1607_v8 = vmul.f32 %v2648_v27, %v1589_v28  ;;  %v3131_v25 = vld [vmem:[#allocation24_spill] sm:$0xff] }
 0x279   :  { %v1818_v5 = vpop.eup %1817 }
 0x27a   :  { %v1670_v41 = vmul.f32 %v1818_v5, %v2704_v56  ;;  %v1070_v44 = vadd.f32 %v1054_v38, %v988_v61  ;;  %v463_v52 = vpop.permute.xlu0 %462  ;;  %v671_v23 = vadd.f32 %v655_v16, %v567_v42  ;;  %v3130_v5 = vld [vmem:[#allocation23_spill] sm:$0xff]  ;;  %v3132_v42 = vld [vmem:[#allocation14_spill] sm:$0xff] }
 0x27b   :  { %v555_v45 = vsel %vm475_vm5, %v463_v52, 0.0  ;;  %v661_v37 = vmul.f32 %v2066_v46, %v3130_v5 }
 0x27c   :  { %1686 = vst [vmem:[#allocation5 + $0x8] sm:$0xff] %v1670_v41  ;;  %v1184_v62 = vadd.f32 %v1168_v51, %v1070_v44  ;;  %v453_v54 = vpop.permute.xlu1 %452  ;;  %v573_v60 = vmul.f32 %v2428_v6, %v555_v45  ;;  %v656_v51 = vmul.f32 %v2066_v46, %v3131_v25  ;;  %v970_v41 = vmul.f32 %v2452_v20, %v952_v29 }
 0x27d   :  { %v1820_v14 = vpop.eup %1819  ;;  %v550_v35 = vsel %vm475_vm5, %v453_v54, 0.0  ;;  %v1148_v44 = vsel %vm735_vm6, %v2700_v33, 0.0  ;;  %v662_v54 = vmul.f32 %v2066_v46, %v3132_v42 }
 0x27e   :  { %v1676_v24 = vmul.f32 %v1820_v14, %v2704_v56  ;;  %v1427_v55 = vadd.f32 %v1411_v53, %v1184_v62  ;;  %v692_v43 = vpop.permute.xlu0 %691  ;;  %v568_v34 = vmul.f32 %v2428_v6, %v550_v35  ;;  %v953_v14 = vsel %vm475_vm5, %v2502_v15, 0.0 }
 0x27f   :  { %v758_v9 = vsel %vm735_vm6, %v692_v43, 0.0  ;;  %v677_v45 = vadd.f32 %v661_v37, %v573_v60  ;;  %v1166_v35 = vmul.f32 %v2486_v19, %v1148_v44  ;;  %v959_v60 = vsel %vm475_vm5, %v2516_v30, 0.0  ;;  %v3134_v44 = vld [vmem:[#allocation26_spill] sm:$0xff] }
 0x280   :  { %1692 = vst [vmem:[#allocation5 + $0x38] sm:$0xff] %v1676_v24  ;;  %v1509_v7 = vadd.f32 %v1493_v40, %v1427_v55  ;;  %v776_v38 = vmul.f32 %v2444_v4, %v758_v9  ;;  %v465_v61 = vpop.permute.xlu1 %464  ;;  %v976_v40 = vmul.f32 %v2452_v20, %v958_v3  ;;  %v672_v43 = vadd.f32 %v656_v51, %v568_v34 }
 0x281   :  { %v556_v28 = vsel %vm475_vm5, %v465_v61, 0.0  ;;  %v1149_v30 = vsel %vm735_vm6, %v2524_v17, 0.0 }
 0x282   :  { %v1623_v52 = vadd.f32 %v1607_v8, %v1509_v7  ;;  %v792_v53 = vadd.f32 %v776_v38, %v671_v23  ;;  %v704_v62 = vpop.permute.xlu0 %703  ;;  %v574_v10 = vmul.f32 %v2428_v6, %v556_v28  ;;  %v971_v23 = vmul.f32 %v2452_v20, %v953_v14 }
 0x283   :  { %v764_v16 = vsel %vm735_vm6, %v704_v62, 0.0  ;;  %v1154_v38 = vsel %vm735_vm6, %v2710_v39, 0.0 }
 0x284   :  { %v1641_v33 = vadd.f32 %v2661_v31, %v1623_v52  ;;  %v986_v29 = vadd.f32 %v970_v41, %v792_v53  ;;  %v782_v24 = vmul.f32 %v2444_v4, %v764_v16  ;;  %v694_v55 = vpop.permute.xlu1 %693  ;;  %v1491_v52 = vmul.f32 %v2017_v32, %v3134_v44 }
 0x285   :  { %v759_v15 = vsel %vm735_vm6, %v694_v55, 0.0  ;;  %v678_v53 = vadd.f32 %v662_v54, %v574_v10  ;;  %v1172_v16 = vmul.f32 %v2486_v19, %v1154_v38  ;;  %v3137_v38 = vld [vmem:[#allocation28_spill] sm:$0xff] }
 0x286   :  { %1821 = vtanh.f32 %v1641_v33  ;;  %v798_v8 = vadd.f32 %v782_v24, %v677_v45  ;;  %v777_v3 = vmul.f32 %v2444_v4, %v759_v15  ;;  %v1300_v9 = vpop.permute.xlu0 %1299  ;;  %v1068_v7 = vadd.f32 %v1052_v11, %v986_v29  ;;  %v3133_v11 = vld [vmem:[#allocation11_spill] sm:$0xff] }
 0x287   :  { %v1391_v61 = vsel %vm475_vm5, %v1300_v9, 0.0  ;;  %v1053_v34 = vmul.f32 %v3133_v11, %v2002_v26  ;;  %v1392_v33 = vsel %vm475_vm5, %v2713_v47, 0.0  ;;  %v1167_v45 = vmul.f32 %v2486_v19, %v1149_v30 }
 0x288   :  { %v992_v5 = vadd.f32 %v976_v40, %v798_v8  ;;  %v793_v37 = vadd.f32 %v777_v3, %v672_v43  ;;  %v1182_v25 = vadd.f32 %v1166_v35, %v1068_v7  ;;  %v1409_v51 = vmul.f32 %v2605_v36, %v1391_v61  ;;  %v706_v41 = vpop.permute.xlu1 %705  ;;  %v3135_v35 = vld [vmem:[#allocation34_spill] sm:$0xff] }
 0x289   :  { %v765_v39 = vsel %vm735_vm6, %v706_v41, 0.0  ;;  %v977_v40 = vmul.f32 %v2452_v20, %v959_v60  ;;  %v1410_v47 = vmul.f32 %v2605_v36, %v1392_v33  ;;  %v1490_v61 = vmul.f32 %v2017_v32, %v3137_v38 }
 0x28a   :  { %v987_v28 = vadd.f32 %v971_v23, %v793_v37  ;;  %v783_v62 = vmul.f32 %v2444_v4, %v765_v39  ;;  %v1074_v42 = vadd.f32 %v1058_v21, %v992_v5  ;;  %v1312_v14 = vpop.permute.xlu0 %1311  ;;  %v1425_v54 = vadd.f32 %v1409_v51, %v1182_v25  ;;  %v3136_v23 = vld [vmem:[#allocation12_spill] sm:$0xff] }
 0x28b   :  { %v1397_v17 = vsel %vm475_vm5, %v1312_v14, 0.0  ;;  %v1155_v21 = vsel %vm735_vm6, %v3135_v35, 0.0  ;;  %v1492_v60 = vmul.f32 %v2017_v32, %v3136_v23  ;;  %v1588_v5 = vsel %vm735_vm6, %v2720_v22, 0.0 }
 0x28c   :  { %v1069_v29 = vadd.f32 %v1053_v34, %v987_v28  ;;  %v799_v24 = vadd.f32 %v783_v62, %v678_v53  ;;  %v1298_v55 = vpop.permute.xlu1 %1297  ;;  %v1188_v43 = vadd.f32 %v1172_v16, %v1074_v42  ;;  %v1415_v10 = vmul.f32 %v2605_v36, %v1397_v17  ;;  %v3138_v53 = vld [vmem:[#allocation10_spill] sm:$0xff]  ;;  %v3140_v17 = vld [vmem:[#allocation29_spill] sm:$0xff] }
 0x28d   :  { %v1390_v15 = vsel %vm475_vm5, %v1298_v55, 0.0  ;;  %v1173_v25 = vmul.f32 %v2486_v19, %v1155_v21  ;;  %v1507_v41 = vadd.f32 %v1491_v52, %v1425_v54  ;;  %v1606_v22 = vmul.f32 %v2648_v27, %v1588_v5  ;;  %v3139_v52 = vld [vmem:[#allocation17_spill] sm:$0xff] }
 0x28e   :  { %v1183_v8 = vadd.f32 %v1167_v45, %v1069_v29  ;;  %v993_v3 = vadd.f32 %v977_v40, %v799_v24  ;;  %v1408_v9 = vmul.f32 %v2605_v36, %v1390_v15  ;;  %v1528_v7 = vpop.permute.xlu0 %1527  ;;  %v1431_v44 = vadd.f32 %v1415_v10, %v1188_v43 }
 0x28f   :  { %v1587_v37 = vsel %vm735_vm6, %v1528_v7, 0.0  ;;  %v1497_v33 = vmul.f32 %v2017_v32, %v3139_v52  ;;  %v1496_v45 = vmul.f32 %v2017_v32, %v3140_v17 }
 0x290   :  { %v1426_v51 = vadd.f32 %v1410_v47, %v1183_v8  ;;  %v1605_v11 = vmul.f32 %v2648_v27, %v1587_v37  ;;  %v1310_v34 = vpop.permute.xlu1 %1309  ;;  %v1424_v30 = vadd.f32 %v1408_v9, %v2681_v18  ;;  %v1075_v28 = vadd.f32 %v3138_v53, %v993_v3  ;;  %v3141_v53 = vld [vmem:[#allocation18_spill] sm:$0xff] }
 0x291   :  { %v1396_v39 = vsel %vm475_vm5, %v1310_v34, 0.0  ;;  %v1513_v43 = vadd.f32 %v1497_v33, %v1431_v44 }
 0x292   :  { %v1508_v62 = vadd.f32 %v1492_v60, %v1426_v51  ;;  %v1621_v42 = vadd.f32 %v1605_v11, %v1507_v41  ;;  %v1414_v14 = vmul.f32 %v2605_v36, %v1396_v39  ;;  %v1540_v40 = vpop.permute.xlu0 %1539  ;;  %v2861_v29 = vadd.f32 %v1173_v25, %v1075_v28 }
 0x293   :  { %v1822_v16 = vpop.eup %1821  ;;  %v1593_v18 = vsel %vm735_vm6, %v1540_v40, 0.0  ;;  %v1506_v15 = vadd.f32 %v1490_v61, %v1424_v30  ;;  %v663_v28 = vmul.f32 %v2066_v46, %v3141_v53 }
 0x294   :  { %v1675_v54 = vmul.f32 %v1822_v16, %v2704_v56  ;;  %v1622_v24 = vadd.f32 %v1606_v22, %v1508_v62  ;;  %v1639_v55 = vadd.f32 %v2661_v31, %v1621_v42  ;;  %v1430_v35 = vadd.f32 %v1414_v14, %v2692_v49  ;;  %v1526_v21 = vpop.permute.xlu1 %1525 }
 0x295   :  { %v1611_v10 = vmul.f32 %v2648_v27, %v1593_v18  ;;  %v1586_v47 = vsel %vm735_vm6, %v1526_v21, 0.0 }
 0x296   :  { %1691 = vst [vmem:[#allocation5 + $0x30] sm:$0xff] %v1675_v54  ;;  %v1640_v8 = vadd.f32 %v2661_v31, %v1622_v24  ;;  %1823 = vtanh.f32 %v1639_v55  ;;  %v1604_v3 = vmul.f32 %v2648_v27, %v1586_v47  ;;  %v877_v9 = vpop.permute.xlu0 %876  ;;  %v1512_v7 = vadd.f32 %v1496_v45, %v1430_v35  ;;  %v3143_v47 = vld [vmem:[#allocation32_spill] sm:$0xff] }
 0x297   :  { %v1627_v23 = vadd.f32 %v1611_v10, %v1513_v43  ;;  %v960_v22 = vsel %vm475_vm5, %v877_v9, 0.0  ;;  %v3142_v10 = vld [vmem:[#allocation13_spill] sm:$0xff] }
 0x298   :  { %1825 = vtanh.f32 %v1640_v8  ;;  %v1620_v60 = vadd.f32 %v1604_v3, %v1506_v15  ;;  %v1538_v49 = vpop.permute.xlu1 %1537  ;;  %v978_v45 = vmul.f32 %v2452_v20, %v960_v22  ;;  %v1060_v15 = vmul.f32 %v2002_v26, %v3142_v10 }
 0x299   :  { %v1645_v38 = vadd.f32 %v2661_v31, %v1627_v23  ;;  %v1592_v61 = vsel %vm735_vm6, %v1538_v49, 0.0  ;;  %v664_v8 = vmul.f32 %v2066_v46, %v3143_v47  ;;  %v961_v3 = vsel %vm475_vm5, %v2730_v13, 0.0 }
 0x29a   :  { %v1638_v5 = vadd.f32 %v2661_v31, %v1620_v60  ;;  %v1610_v37 = vmul.f32 %v2648_v27, %v1592_v61  ;;  %v1105_v25 = vpop.permute.xlu0 %1104  ;;  %v1061_v22 = vmul.f32 %v2076_v48, %v2002_v26 }
 0x29b   :  { %1827 = vtanh.f32 %v1645_v38  ;;  %v1156_v24 = vsel %vm735_vm6, %v1105_v25, 0.0 }
 0x29c   :  { %1829 = vtanh.f32 %v1638_v5  ;;  %v1626_v51 = vadd.f32 %v1610_v37, %v1512_v7  ;;  %v2876_v41 = vpop.permute.xlu1 %882  ;;  %v1174_v49 = vmul.f32 %v2486_v19, %v1156_v24 }
 0x29e   :  { %v1644_v11 = vadd.f32 %v2661_v31, %v1626_v51  ;;  %v467_v34 = vpop.permute.xlu0 %466 }
 0x29f   :  { %v557_v44 = vsel %vm475_vm5, %v467_v34, 0.0 }
 0x2a0   :  { %1831 = vtanh.f32 %v1644_v11  ;;  %v575_v30 = vmul.f32 %v2428_v6, %v557_v44  ;;  %v2882_v39 = vpop.permute.xlu1 %1110  ;;  %v979_v11 = vmul.f32 %v2452_v20, %v961_v3 }
 0x2a2   :  { %v708_v62 = vpop.permute.xlu0 %707  ;;  %v679_v16 = vadd.f32 %v663_v28, %v575_v30 }
 0x2a3   :  { %v1824_v42 = vpop.eup %1823  ;;  %v766_v14 = vsel %vm735_vm6, %v708_v62, 0.0  ;;  %v1499_v62 = vmul.f32 %v2017_v32, %v2476_v63 }
 0x2a4   :  { %v1673_v40 = vmul.f32 %v1824_v42, %v2704_v56  ;;  %v784_v52 = vmul.f32 %v2444_v4, %v766_v14  ;;  %v469_v33 = vpop.permute.xlu1 %468  ;;  %v1157_v42 = vsel %vm735_vm6, %v2738_v1, 0.0 }
 0x2a5   :  { %v1826_v17 = vpop.eup %1825  ;;  %v558_v18 = vsel %vm475_vm5, %v469_v33, 0.0 }
 0x2a6   :  { %v1674_v54 = vmul.f32 %v1826_v17, %v2704_v56  ;;  %1689 = vst [vmem:[#allocation5 + $0x20] sm:$0xff] %v1673_v40  ;;  %v800_v55 = vadd.f32 %v784_v52, %v679_v16  ;;  %v576_v35 = vmul.f32 %v2428_v6, %v558_v18  ;;  %v1316_v21 = vpop.permute.xlu0 %1315  ;;  %v1175_v18 = vmul.f32 %v2486_v19, %v1157_v42  ;;  %v3150_v42 = vld [vmem:[#allocation33_spill] sm:$0xff] }
 0x2a7   :  { %v1399_v38 = vsel %vm475_vm5, %v1316_v21, 0.0 }
 0x2a8   :  { %v1828_v43 = vpop.eup %1827  ;;  %1690 = vst [vmem:[#allocation5 + $0x28] sm:$0xff] %v1674_v54  ;;  %v994_v9 = vadd.f32 %v978_v45, %v800_v55  ;;  %v710_v7 = vpop.permute.xlu1 %709  ;;  %v680_v37 = vadd.f32 %v664_v8, %v576_v35  ;;  %v1417_v44 = vmul.f32 %v2605_v36, %v1399_v38  ;;  %v3144_v45 = vld [vmem:[#allocation19_spill] sm:$0xff] }
 0x2a9   :  { %v1830_v23 = vpop.eup %1829  ;;  %v1679_v60 = vmul.f32 %v1828_v43, %v2704_v56  ;;  %v767_v61 = vsel %vm735_vm6, %v710_v7, 0.0  ;;  %v1498_v48 = vmul.f32 %v2017_v32, %v3144_v45 }
 0x2aa   :  { %v1672_v5 = vmul.f32 %v1830_v23, %v2704_v56  ;;  %v1076_v25 = vadd.f32 %v1060_v15, %v994_v9  ;;  %v785_v13 = vmul.f32 %v2444_v4, %v767_v61  ;;  %v2914_v51 = vpop.permute.xlu0 %880  ;;  %v3146_v9 = vld [vmem:[#allocation25_spill] sm:$0xff] }
 0x2ab   :  { %1695 = vst [vmem:[#allocation5 + $0x50] sm:$0xff] %v1679_v60  ;;  %v948_v7 = vsel %vm475_vm5, %v3146_v9, 0.0  ;;  %v3147_v60 = vld [vmem:[#allocation20_spill] sm:$0xff] }
 0x2ac   :  { %1688 = vst [vmem:[#allocation5 + $0x18] sm:$0xff] %v1672_v5  ;;  %v1190_v34 = vadd.f32 %v1174_v49, %v1076_v25  ;;  %v801_v30 = vadd.f32 %v785_v13, %v680_v37  ;;  %v1314_v53 = vpop.permute.xlu1 %1313  ;;  %v966_v25 = vmul.f32 %v2452_v20, %v948_v7 }
 0x2ad   :  { %v1832_v28 = vpop.eup %1831  ;;  %v1398_v14 = vsel %vm475_vm5, %v1314_v53, 0.0 }
 0x2ae   :  { %v1678_v40 = vmul.f32 %v1832_v28, %v2704_v56  ;;  %v1433_v16 = vadd.f32 %v1417_v44, %v1190_v34  ;;  %v995_v52 = vadd.f32 %v979_v11, %v801_v30  ;;  %v1416_v33 = vmul.f32 %v2605_v36, %v1398_v14  ;;  %v1109_v17 = vpop.permute.xlu0 %1108  ;;  %v3148_v11 = vld [vmem:[#allocation27_spill] sm:$0xff]  ;;  %v3149_v44 = vld [vmem:[#allocation30_spill] sm:$0xff] }
 0x2af   :  { %v1144_v34 = vsel %vm735_vm6, %v3148_v11, 0.0  ;;  %v1387_v30 = vsel %vm475_vm5, %v3149_v44, 0.0  ;;  %v1062_v14 = vmul.f32 %v2002_v26, %v3150_v42 }
 0x2b0   :  { %1694 = vst [vmem:[#allocation5 + $0x48] sm:$0xff] %v1678_v40  ;;  %v1432_v63 = vadd.f32 %v1416_v33, %v2861_v29  ;;  %v1542_v54 = vpop.permute.xlu1 %1541  ;;  %v1077_v24 = vadd.f32 %v1061_v22, %v995_v52  ;;  %v2937_v55 = vadd.f32 %v1499_v62, %v1433_v16  ;;  %v1063_v62 = vmul.f32 %v2125_v2, %v2002_v26 }
 0x2b1   :  { %v1594_v35 = vsel %vm735_vm6, %v1542_v54, 0.0  ;;  %v666_v16 = vmul.f32 %v2066_v46, %v2541_v50  ;;  %v963_v52 = vsel %vm475_vm5, %v2876_v41, 0.0  ;;  %v1405_v2 = vmul.f32 %v2605_v36, %v1387_v30  ;;  %v3154_v54 = vld [vmem:[#allocation8_spill] sm:$0xff] }
 0x2b2   :  { %v1514_v21 = vadd.f32 %v1498_v48, %v1432_v63  ;;  %v1612_v43 = vmul.f32 %v2648_v27, %v1594_v35  ;;  %v443_v10 = vpop.permute.xlu0 %442  ;;  %v2942_v15 = vadd.f32 %v1175_v18, %v1077_v24  ;;  %v1162_v18 = vmul.f32 %v2486_v19, %v1144_v34  ;;  %v3155_v35 = vld [vmem:[#allocation31_spill] sm:$0xff] }
 0x2b3   :  { %v545_v47 = vsel %vm510_vm7, %v443_v10, 0.0  ;;  %v665_v26 = vmul.f32 %v2066_v46, %v2549_v12  ;;  %v962_v50 = vsel %vm475_vm5, %v2914_v51, 0.0  ;;  %v981_v51 = vmul.f32 %v2452_v20, %v963_v52 }
 0x2b4   :  { %v1628_v29 = vadd.f32 %v1612_v43, %v1514_v21  ;;  %v563_v8 = vmul.f32 %v2428_v6, %v545_v47  ;;  %v2945_v3 = vpop.permute.xlu1 %1321  ;;  %v1583_v21 = vsel %vm735_vm6, %v3155_v35, 0.0  ;;  %v1159_v43 = vsel %vm735_vm6, %v2882_v39, 0.0 }
 0x2b6   :  { %v1646_v23 = vadd.f32 %v2661_v31, %v1628_v29  ;;  %v667_v49 = vadd.f32 %v3147_v60, %v563_v8  ;;  %v684_v38 = vpop.permute.xlu0 %683  ;;  %v1158_v60 = vsel %vm735_vm6, %v1109_v17, 0.0  ;;  %v1177_v17 = vmul.f32 %v2486_v19, %v1159_v43 }
 0x2b7   :  { %v754_v61 = vsel %vm738_vm8, %v684_v38, 0.0 }
 0x2b8   :  { %1833 = vtanh.f32 %v1646_v23  ;;  %v772_v5 = vmul.f32 %v2444_v4, %v754_v61  ;;  %v473_v37 = vpop.permute.xlu1 %472  ;;  %v980_v23 = vmul.f32 %v2452_v20, %v962_v50  ;;  %v1500_v20 = vmul.f32 %v2017_v32, %v2583_v58 }
 0x2b9   :  { %v560_v13 = vsel %vm475_vm5, %v473_v37, 0.0 }
 0x2ba   :  { %v788_v53 = vadd.f32 %v772_v5, %v667_v49  ;;  %v578_v28 = vmul.f32 %v2428_v6, %v560_v13  ;;  %v471_v22 = vpop.permute.xlu0 %470  ;;  %v1402_v49 = vsel %vm2992_vm9, %v2945_v3, 0.0  ;;  %v3156_v3 = vld [vmem:[#allocation9_spill] sm:$0xff] }
 0x2bb   :  { %v559_v40 = vsel %vm475_vm5, %v471_v22, 0.0  ;;  %v1176_v22 = vmul.f32 %v2486_v19, %v1158_v60  ;;  %v1420_v42 = vmul.f32 %v2605_v36, %v1402_v49 }
 0x2bc   :  { %v982_v33 = vadd.f32 %v966_v25, %v788_v53  ;;  %v577_v45 = vmul.f32 %v2428_v6, %v559_v40  ;;  %v714_v48 = vpop.permute.xlu1 %713  ;;  %v682_v24 = vadd.f32 %v666_v16, %v578_v28 }
 0x2bd   :  { %v769_v63 = vsel %vm735_vm6, %v714_v48, 0.0 }
 0x2be   :  { %v1064_v1 = vadd.f32 %v3154_v54, %v982_v33  ;;  %v787_v46 = vmul.f32 %v2444_v4, %v769_v63  ;;  %v712_v12 = vpop.permute.xlu0 %711  ;;  %v681_v29 = vadd.f32 %v665_v26, %v577_v45 }
 0x2bf   :  { %v768_v10 = vsel %vm735_vm6, %v712_v12, 0.0 }
 0x2c0   :  { %v1178_v47 = vadd.f32 %v1162_v18, %v1064_v1  ;;  %v803_v8 = vadd.f32 %v787_v46, %v682_v24  ;;  %v786_v9 = vmul.f32 %v2444_v4, %v768_v10  ;;  %v1318_v7 = vpop.permute.xlu1 %1317  ;;  %v1601_v4 = vmul.f32 %v2648_v27, %v1583_v21 }
 0x2c1   :  { %v1400_v39 = vsel %vm475_vm5, %v1318_v7, 0.0 }
 0x2c2   :  { %v1421_v38 = vadd.f32 %v1405_v2, %v1178_v47  ;;  %v997_v61 = vadd.f32 %v981_v51, %v803_v8  ;;  %v802_v5 = vadd.f32 %v786_v9, %v681_v29  ;;  %v1418_v37 = vmul.f32 %v2605_v36, %v1400_v39  ;;  %v1544_v25 = vpop.permute.xlu0 %1543 }
 0x2c3   :  { %v1595_v13 = vsel %vm735_vm6, %v1544_v25, 0.0 }
 0x2c4   :  { %v1503_v11 = vadd.f32 %v3156_v3, %v1421_v38  ;;  %v1079_v34 = vadd.f32 %v1063_v62, %v997_v61  ;;  %v996_v44 = vadd.f32 %v980_v23, %v802_v5  ;;  %v1434_v30 = vadd.f32 %v1418_v37, %v2942_v15  ;;  %v1546_v53 = vpop.permute.xlu1 %1545 }
 0x2c5   :  { %v1834_v28 = vpop.eup %1833  ;;  %v1613_v40 = vmul.f32 %v2648_v27, %v1595_v13  ;;  %v1596_v58 = vsel %vm735_vm6, %v1546_v53, 0.0 }
 0x2c6   :  { %v1680_v16 = vmul.f32 %v1834_v28, %v2704_v56  ;;  %v1617_v52 = vadd.f32 %v1601_v4, %v1503_v11  ;;  %v1516_v33 = vadd.f32 %v1500_v20, %v1434_v30  ;;  %v1614_v62 = vmul.f32 %v2648_v27, %v1596_v58  ;;  %v1320_v45 = vpop.permute.xlu0 %1319 }
 0x2c7   :  { %v1629_v15 = vadd.f32 %v1613_v40, %v2937_v55  ;;  %v1078_v48 = vadd.f32 %v1062_v14, %v996_v44  ;;  %v1401_v18 = vsel %vm475_vm5, %v1320_v45, 0.0  ;;  %v1193_v2 = vadd.f32 %v1177_v17, %v1079_v34 }
 0x2c8   :  { %1696 = vst [vmem:[#allocation5 + $0x58] sm:$0xff] %v1680_v16  ;;  %v1635_v26 = vadd.f32 %v2661_v31, %v1617_v52  ;;  %v1630_v63 = vadd.f32 %v1614_v62, %v1516_v33  ;;  %v1419_v50 = vmul.f32 %v2605_v36, %v1401_v18  ;;  %v1550_v6 = vpop.permute.xlu1 %1549  ;;  %v1501_v55 = vmul.f32 %v2017_v32, %v2627_v59  ;;  %v3159_v36 = vld [vmem:[#allocation21_spill] sm:$0xff] }
 0x2c9   :  { %v1647_v41 = vadd.f32 %v2661_v31, %v1629_v15  ;;  %v1192_v54 = vadd.f32 %v1176_v22, %v1078_v48  ;;  %v1436_v1 = vadd.f32 %v1420_v42, %v1193_v2  ;;  %v1598_v24 = vsel %vm3036_vm10, %v1550_v6, 0.0 }
 0x2ca   :  { %1835 = vtanh.f32 %v1635_v26  ;;  %v1648_v0 = vadd.f32 %v2661_v31, %v1630_v63  ;;  %v1616_v14 = vmul.f32 %v2648_v27, %v1598_v24  ;;  %v1548_v46 = vpop.permute.xlu0 %1547 }
 0x2cb   :  { %1837 = vtanh.f32 %v1647_v41  ;;  %v1435_v12 = vadd.f32 %v1419_v50, %v1192_v54  ;;  %v1518_v35 = vadd.f32 %v3159_v36, %v1436_v1  ;;  %v1597_v21 = vsel %vm735_vm6, %v1548_v46, 0.0 }
 0x2cc   :  { %1839 = vtanh.f32 %v1648_v0  ;;  %v1615_v51 = vmul.f32 %v2648_v27, %v1597_v21 }
 0x2cd   :  { %v1632_v43 = vadd.f32 %v1616_v14, %v1518_v35  ;;  %v1517_v10 = vadd.f32 %v1501_v55, %v1435_v12 }
 0x2cf   :  { %v1650_v32 = vadd.f32 %v2661_v31, %v1632_v43  ;;  %v1631_v59 = vadd.f32 %v1615_v51, %v1517_v10 }
 0x2d1   :  { %1841 = vtanh.f32 %v1650_v32  ;;  %v1649_v47 = vadd.f32 %v2661_v31, %v1631_v59 }
 0x2d3   :  { %1843 = vtanh.f32 %v1649_v47 }
 0x2d7   :  { %v1836_v29 = vpop.eup %1835 }
 0x2d8   :  { %v1838_v8 = vpop.eup %1837  ;;  %v1669_v9 = vmul.f32 %v1836_v29, %v2704_v56 }
 0x2d9   :  { %v1840_v7 = vpop.eup %1839  ;;  %v1681_v57 = vmul.f32 %v1838_v8, %v2704_v56 }
 0x2da   :  { %1685 = vst [vmem:[#allocation5] sm:$0xff] %v1669_v9  ;;  %v1682_v23 = vmul.f32 %v1840_v7, %v2704_v56 }
 0x2db   :  { %1697 = vst [vmem:[#allocation5 + $0x60] sm:$0xff] %v1681_v57 }
 0x2dc   :  { %1698 = vst [vmem:[#allocation5 + $0x68] sm:$0xff] %v1682_v23 }
 0x2de   :  { %v1842_v27 = vpop.eup %1841 }
 0x2df   :  { %v1684_v60 = vmul.f32 %v1842_v27, %v2704_v56 }
 0x2e0   :  { %v1844_v49 = vpop.eup %1843 }
 0x2e1   :  { %1700 = vst [vmem:[#allocation5 + $0x78] sm:$0xff] %v1684_v60  ;;  %v1683_v31 = vmul.f32 %v1844_v49, %v2704_v56 }
 0x2e3   :  { %1699 = vst [vmem:[#allocation5 + $0x70] sm:$0xff] %v1683_v31 }
 0x2e4   :  { %1868 = shalt.err (!%p1865_p9)
}
 0x2e5   :  { %s1885_s17 = smov 128   ;;  %s1886_s18 = smov 8  }
 0x2e6   :  { %1712 = dma.vmem_to_hbm [thread:$0]  %s1707_s15, 2048, %s3070_s4, [#allocation3], %s1885_s17, %s1885_s17, %s1886_s18  }
 0x2e7   :  { %1879 = dma.done.wait [#allocation3], 2048  }
 0x2e8   :  { %1880 = vsyncadd [#allocation3], 4294965248 }
 0x2e9   :  { %1716 = vsyncpa [#allocation3], 1 }
 0x2ea   :  { %1717 = vsyncpa [#allocation4], 1 }

</bundles_post_ra>
